<compile_context>
chip_gen: v5e
topology: v5e:2x2
jax: 0.10.0
libtpu: 0.0.40
codegen_flags: <defaults>
</compile_context>

<pallas_src>
import functools

import jax
import jax.numpy as jnp
from jax import lax
from jax.experimental import pallas as pl
from jax.experimental.pallas import tpu as pltpu

NEG_SLOPE = 0.2          # nn.LeakyReLU(0.2)


def _lrelu(x):
    return jnp.where(x > 0, x, NEG_SLOPE * x)


def _round_up(a, b):
    return (a + b - 1) // b * b


# ----------------------------------------------------------------------------
# Fused FEB kernel (one batch element per grid step).
# ----------------------------------------------------------------------------
def _feb_kernel(x_ref, cm_ref, w1_ref, b1_ref, wm_ref, bm_ref, wd_ref, bd_ref,
                y_ref, res_ref,
                xpad_ref, apad_ref,
                *, H, W, cdt):
    M = H * W
    off0 = W + 1                       # start of the data inside the padded planes

    mask_l = cm_ref[0:1, :]            # kills dx=0 taps at w == 0      (1, M)
    mask_r = cm_ref[1:2, :]            # kills dx=2 taps at w == W-1    (1, M)

    # Re-establish the zero halo (leading W+1 lanes + trailing tail) each grid
    # step.  Cheap, and keeps the kernel correct when the batch axis is sharded
    # across cores.  The interior is always overwritten by stash().
    def zero_halo(pad_ref):
        C, Lp = pad_ref.shape
        pad_ref[:, :off0] = jnp.zeros((C, off0), pad_ref.dtype)
        pad_ref[:, off0 + M:] = jnp.zeros((C, Lp - off0 - M), pad_ref.dtype)

    zero_halo(xpad_ref)
    zero_halo(apad_ref)

    def stash(pad_ref, act):
        # Single contiguous, lane-dense store of the whole activation.
        pad_ref[:, off0:off0 + M] = act.astype(cdt)

    def conv3x3(pad_ref, wmat, bias):
        # 3x3 "same" conv as ONE flipped MXU matmul: (Cout, 9C) @ (9C, M).
        taps = []
        for dy in range(3):
            for dx in range(3):
                s = off0 + (dy - 1) * W + (dx - 1)
                t = pad_ref[:, s:s + M]             # contiguous lane slice (C, M)
                if dx == 0:
                    t = t * mask_l                  # left-edge wraparound -> 0
                elif dx == 2:
                    t = t * mask_r                  # right-edge wraparound -> 0
                taps.append(t)
        patch = jnp.concatenate(taps, axis=0)        # (9C, M), compute dtype
        acc = jnp.dot(wmat, patch, preferred_element_type=jnp.float32)
        return acc + bias                            # (Cout, M) f32

    # --- layer_1: conv + LeakyReLU -------------------------------------------
    stash(xpad_ref, x_ref[0])
    x1 = _lrelu(conv3x3(xpad_ref, w1_ref[...], b1_ref[...]))        # (cmid, M)

    # --- res_1 / res_2 / res_3: LReLU(conv_b(LReLU(conv_a(x))) + x) ----------
    def res_block(xk, k):
        stash(apad_ref, xk)
        h = _lrelu(conv3x3(apad_ref, wm_ref[2 * k], bm_ref[2 * k]))
        stash(apad_ref, h)
        return _lrelu(conv3x3(apad_ref, wm_ref[2 * k + 1], bm_ref[2 * k + 1]) + xk)

    x2 = res_block(x1, 0)
    x3 = res_block(x2, 1)
    res = res_block(x3, 2)

    res_ref[0] = res.astype(res_ref.dtype)           # lane-dense (cmid, H*W) store

    # --- downsample conv + LeakyReLU (stride 1 here; wrapper takes [::2, ::2])
    stash(apad_ref, res)
    y = _lrelu(conv3x3(apad_ref, wd_ref[...], bd_ref[...]))
    y_ref[0] = y.astype(y_ref.dtype)                 # lane-dense (cout, H*W) store


# ----------------------------------------------------------------------------
# Wrapper
# ----------------------------------------------------------------------------
def _prep_conv(w_oihw, b, cdt):
    co, ci, kh, kw = w_oihw.shape
    # OIHW -> (co, dy, dx, ci) -> (co, 9*ci): column order matches the tap order.
    wmat = jnp.transpose(w_oihw, (0, 2, 3, 1)).reshape(co, kh * kw * ci).astype(cdt)
    bias = b.reshape(co, 1).astype(jnp.float32)
    return wmat, bias


def feb_forward(x_nchw, params, compute_dtype=jnp.bfloat16):
    """FEB forward.  Returns (downsampled, pre-downsample), both NCHW."""
    B, cin, H, W = x_nchw.shape
    assert H % 2 == 0 and W % 2 == 0, "stride-2 downsample assumes even H, W"
    M = H * W

    w1, b1 = params["layer_1"]
    cmid = w1.shape[0]
    wd, bd = params["down"]
    cout = wd.shape[0]

    # Pad input channels to a multiple of 8 so every im2col concat piece is
    # sublane-aligned (the extra zero channels contribute nothing).
    cin_p = _round_up(cin, 8)
    if cin_p != cin:
        x_nchw = jnp.pad(x_nchw, ((0, 0), (0, cin_p - cin), (0, 0), (0, 0)))
        w1 = jnp.pad(w1, ((0, 0), (0, cin_p - cin), (0, 0), (0, 0)))

    w1m, b1m = _prep_conv(w1, b1, compute_dtype)
    res_names = ("res_1a", "res_1b", "res_2a", "res_2b", "res_3a", "res_3b")
    wms, bms = zip(*[_prep_conv(*params[n], compute_dtype) for n in res_names])
    wm = jnp.stack(wms)                   # (6, cmid, 9*cmid)
    bm = jnp.stack(bms)                   # (6, cmid, 1)
    wdm, bdm = _prep_conv(wd, bd, compute_dtype)

    # 0/1 lane masks that kill the row-wraparound columns of the dx=0/dx=2 taps.
    col = jnp.arange(M, dtype=jnp.int32) % W
    col_mask = jnp.stack([(col != 0), (col != W - 1)]).astype(compute_dtype)  # (2, M)

    x_flat = x_nchw.reshape(B, cin_p, M)                 # NCHW -> (B, C, H*W), free
    L = _round_up(M + 2 * (W + 1), 128)                  # padded-plane lane length

    kern = functools.partial(_feb_kernel, H=H, W=W, cdt=compute_dtype)

    flops = 2 * B * M * 9 * (cin_p * cmid + 6 * cmid * cmid + cmid * cout)
    bytes_accessed = int(
        x_flat.size * x_flat.dtype.itemsize
        + B * (cmid + cout) * M * x_nchw.dtype.itemsize
        + sum(int(a.size) * a.dtype.itemsize
              for a in (w1m, b1m, wm, bm, wdm, bdm, col_mask)))

    # Per-generation VMEM budget instead of a hardcoded 48 MiB.
    try:
        phys = getattr(pltpu.get_tpu_info(), "vmem_capacity_bytes",
                       64 * 1024 * 1024)
    except Exception:
        phys = 64 * 1024 * 1024
    vmem_limit = int(min(100 * 1024 * 1024, 0.85 * phys))

    y_flat, res_flat = pl.pallas_call(
        kern,
        out_shape=(jax.ShapeDtypeStruct((B, cout, M), x_nchw.dtype),
                   jax.ShapeDtypeStruct((B, cmid, M), x_nchw.dtype)),
        grid=(B,),
        in_specs=[
            pl.BlockSpec((1, cin_p, M), lambda i: (i, 0, 0)),      # x
            pl.BlockSpec((2, M), lambda i: (0, 0)),                # edge masks
            pl.BlockSpec((cmid, 9 * cin_p), lambda i: (0, 0)),     # w1
            pl.BlockSpec((cmid, 1), lambda i: (0, 0)),             # b1
            pl.BlockSpec((6, cmid, 9 * cmid), lambda i: (0, 0, 0)),  # res weights
            pl.BlockSpec((6, cmid, 1), lambda i: (0, 0, 0)),         # res biases
            pl.BlockSpec((cout, 9 * cmid), lambda i: (0, 0)),      # wd
            pl.BlockSpec((cout, 1), lambda i: (0, 0)),             # bd
        ],
        out_specs=(
            pl.BlockSpec((1, cout, M), lambda i: (i, 0, 0)),
            pl.BlockSpec((1, cmid, M), lambda i: (i, 0, 0)),
        ),
        scratch_shapes=[
            pltpu.VMEM((cin_p, L), compute_dtype),   # padded layer_1 input plane
            pltpu.VMEM((cmid, L), compute_dtype),    # padded mid-activation plane
        ],
        compiler_params=pltpu.CompilerParams(
            dimension_semantics=("parallel",),
            vmem_limit_bytes=vmem_limit,
        ),
        cost_estimate=pl.CostEstimate(flops=flops, transcendentals=0,
                                      bytes_accessed=bytes_accessed),
    )(x_flat, col_mask, w1m, b1m, wm, bm, wdm, bdm)

    # Stride-2 subsample of the downsample conv (commutes with LeakyReLU).
    # TODO(synk): move in-kernel once strided lane reads are verified on Mosaic.
    y = y_flat.reshape(B, cout, H, W)[:, :, ::2, ::2]
    res = res_flat.reshape(B, cmid, H, W)
    return y, res


# ----------------------------------------------------------------------------
# Parameter init (deterministic, PyTorch Conv2d-like uniform fan-in scaling).
# ----------------------------------------------------------------------------
def _init_conv(key, cin, cout):
    kw, kb = jax.random.split(key)
    bound = 1.0 / jnp.sqrt(cin * 9.0)
    w = jax.random.uniform(kw, (cout, cin, 3, 3), jnp.float32, -bound, bound)  # OIHW
    b = jax.random.uniform(kb, (cout,), jnp.float32, -bound, bound)
    return w, b


def init_feb_params(key, in_ch, mid_ch, out_ch):
    keys = jax.random.split(key, 8)
    return {
        "layer_1": _init_conv(keys[0], in_ch, mid_ch),
        "res_1a": _init_conv(keys[1], mid_ch, mid_ch),
        "res_1b": _init_conv(keys[2], mid_ch, mid_ch),
        "res_2a": _init_conv(keys[3], mid_ch, mid_ch),
        "res_2b": _init_conv(keys[4], mid_ch, mid_ch),
        "res_3a": _init_conv(keys[5], mid_ch, mid_ch),
        "res_3b": _init_conv(keys[6], mid_ch, mid_ch),
        "down": _init_conv(keys[7], mid_ch, out_ch),
    }


# ----------------------------------------------------------------------------
# Pure-JAX reference (correctness check only).
# ----------------------------------------------------------------------------
def _ref_conv(x, w, b, stride=1):
    y = lax.conv_general_dilated(
        x, w, (stride, stride), ((1, 1), (1, 1)),
        dimension_numbers=("NCHW", "OIHW", "NCHW"),
        precision=lax.Precision.HIGHEST)
    return y + b.reshape(1, -1, 1, 1)


def feb_forward_ref(x, params):
    x1 = _lrelu(_ref_conv(x, *params["layer_1"]))
    x2 = _lrelu(_ref_conv(_lrelu(_ref_conv(x1, *params["res_1a"])), *params["res_1b"]) + x1)
    x3 = _lrelu(_ref_conv(_lrelu(_ref_conv(x2, *params["res_2a"])), *params["res_2b"]) + x2)
    res = _lrelu(_ref_conv(_lrelu(_ref_conv(x3, *params["res_3a"])), *params["res_3b"]) + x3)
    y = _lrelu(_ref_conv(res, *params["down"], stride=2))
    return y, res


if __name__ == "__main__":
    B, Cin, H, W = 2, 4, 16, 16
    mid_ch, out_ch = 8, 16

    key = jax.random.PRNGKey(0)
    k_x, k_p = jax.random.split(key)
    x = jax.random.normal(k_x, (B, Cin, H, W), jnp.float32)      # NCHW like PyTorch
    params = init_feb_params(k_p, Cin, mid_ch, out_ch)

    y_gold, res_gold = feb_forward_ref(x, params)

    # f32-operand path: tight check.
    y32, res32 = jax.jit(functools.partial(feb_forward,
                                           compute_dtype=jnp.float32))(x, params)
    jax.block_until_ready((y32, res32))
    assert y32.shape == (B, out_ch, H // 2, W // 2), y32.shape
    assert res32.shape == (B, mid_ch, H, W), res32.shape
    assert jnp.allclose(y32, y_gold, rtol=5e-3, atol=5e-3)
    assert jnp.allclose(res32, res_gold, rtol=5e-3, atol=5e-3)

    # Default bf16-operand / f32-accumulate path (looser tolerance).
    y16, res16 = jax.jit(feb_forward)(x, params)
    jax.block_until_ready((y16, res16))
    assert y16.shape == (B, out_ch, H // 2, W // 2), y16.shape
    assert res16.shape == (B, mid_ch, H, W), res16.shape
    assert jnp.allclose(y16, y_gold, rtol=5e-2, atol=5e-2)
    assert jnp.allclose(res16, res_gold, rtol=5e-2, atol=5e-2)

    print("KERNEL_OK")
</pallas_src>

<mosaic_0001>
module attributes {stable_mosaic.version = 11 : i64} {
  func.func @_feb_kernel(%arg0: i32, %arg1: memref<1x8x256xf32, #tpu.memory_space<vmem>>, %arg2: memref<2x256xf32, #tpu.memory_space<vmem>>, %arg3: memref<8x72xf32, #tpu.memory_space<vmem>>, %arg4: memref<8x1xf32, #tpu.memory_space<vmem>>, %arg5: memref<6x8x72xf32, #tpu.memory_space<vmem>>, %arg6: memref<6x8x1xf32, #tpu.memory_space<vmem>>, %arg7: memref<16x72xf32, #tpu.memory_space<vmem>>, %arg8: memref<16x1xf32, #tpu.memory_space<vmem>>, %arg9: memref<1x16x256xf32, #tpu.memory_space<vmem>>, %arg10: memref<1x8x256xf32, #tpu.memory_space<vmem>>, %arg11: memref<8x384xf32, #tpu.memory_space<vmem>>, %arg12: memref<8x384xf32, #tpu.memory_space<vmem>>) attributes {dimension_semantics = [#tpu.dimension_semantics<parallel>], iteration_bounds = array<i64: 2>, scalar_prefetch = 0 : i64, scratch_operands = 2 : i64, tpu.core_type = #tpu.core_type<tc>, window_params = [{transform_indices = @transform_0, window_bounds = array<i64: 1, 8, 256>}, {pipeline_mode = #tpu.pipeline_mode<synchronous>, transform_indices = @transform_1, window_bounds = array<i64: 2, 256>}, {pipeline_mode = #tpu.pipeline_mode<synchronous>, transform_indices = @transform_2, window_bounds = array<i64: 8, 72>}, {pipeline_mode = #tpu.pipeline_mode<synchronous>, transform_indices = @transform_3, window_bounds = array<i64: 8, 1>}, {pipeline_mode = #tpu.pipeline_mode<synchronous>, transform_indices = @transform_4, window_bounds = array<i64: 6, 8, 72>}, {pipeline_mode = #tpu.pipeline_mode<synchronous>, transform_indices = @transform_5, window_bounds = array<i64: 6, 8, 1>}, {pipeline_mode = #tpu.pipeline_mode<synchronous>, transform_indices = @transform_6, window_bounds = array<i64: 16, 72>}, {pipeline_mode = #tpu.pipeline_mode<synchronous>, transform_indices = @transform_7, window_bounds = array<i64: 16, 1>}, {transform_indices = @transform_8, window_bounds = array<i64: 1, 16, 256>}, {transform_indices = @transform_9, window_bounds = array<i64: 1, 8, 256>}]} {
    %c0 = arith.constant 0 : index
    %c0_0 = arith.constant 0 : index
    %0 = vector.load %arg2[%c0, %c0_0] : memref<2x256xf32, #tpu.memory_space<vmem>>, vector<1x256xf32>
    %c1 = arith.constant 1 : index
    %c0_1 = arith.constant 0 : index
    %1 = vector.load %arg2[%c1, %c0_1] : memref<2x256xf32, #tpu.memory_space<vmem>>, vector<1x256xf32>
    %cst = arith.constant 0.000000e+00 : f32
    %2 = vector.broadcast %cst : f32 to vector<8x17xf32>
    %c0_2 = arith.constant 0 : index
    %c0_3 = arith.constant 0 : index
    %3 = vector.load %arg11[%c0_2, %c0_3] : memref<8x384xf32, #tpu.memory_space<vmem>>, vector<8x17xf32>
    tpu.vector_store %arg11[%c0_2, %c0_3], %2 {strides = array<i32>} : memref<8x384xf32, #tpu.memory_space<vmem>>, vector<8x17xf32>,
    %cst_4 = arith.constant 0.000000e+00 : f32
    %4 = vector.broadcast %cst_4 : f32 to vector<8x111xf32>
    %c0_5 = arith.constant 0 : index
    %c273 = arith.constant 273 : index
    %5 = vector.load %arg11[%c0_5, %c273] : memref<8x384xf32, #tpu.memory_space<vmem>>, vector<8x111xf32>
    tpu.vector_store %arg11[%c0_5, %c273], %4 {strides = array<i32>} : memref<8x384xf32, #tpu.memory_space<vmem>>, vector<8x111xf32>,
    %cst_6 = arith.constant 0.000000e+00 : f32
    %6 = vector.broadcast %cst_6 : f32 to vector<8x17xf32>
    %c0_7 = arith.constant 0 : index
    %c0_8 = arith.constant 0 : index
    %7 = vector.load %arg12[%c0_7, %c0_8] : memref<8x384xf32, #tpu.memory_space<vmem>>, vector<8x17xf32>
    tpu.vector_store %arg12[%c0_7, %c0_8], %6 {strides = array<i32>} : memref<8x384xf32, #tpu.memory_space<vmem>>, vector<8x17xf32>,
    %cst_9 = arith.constant 0.000000e+00 : f32
    %8 = vector.broadcast %cst_9 : f32 to vector<8x111xf32>
    %c0_10 = arith.constant 0 : index
    %c273_11 = arith.constant 273 : index
    %9 = vector.load %arg12[%c0_10, %c273_11] : memref<8x384xf32, #tpu.memory_space<vmem>>, vector<8x111xf32>
    tpu.vector_store %arg12[%c0_10, %c273_11], %8 {strides = array<i32>} : memref<8x384xf32, #tpu.memory_space<vmem>>, vector<8x111xf32>,
    %c0_12 = arith.constant 0 : index
    %c0_13 = arith.constant 0 : index
    %c0_14 = arith.constant 0 : index
    %10 = vector.load %arg1[%c0_12, %c0_13, %c0_14] : memref<1x8x256xf32, #tpu.memory_space<vmem>>, vector<1x8x256xf32>
    %11 = vector.shape_cast %10 : vector<1x8x256xf32> to vector<8x256xf32>
    %c0_15 = arith.constant 0 : index
    %c17 = arith.constant 17 : index
    %12 = vector.load %arg11[%c0_15, %c17] : memref<8x384xf32, #tpu.memory_space<vmem>>, vector<8x256xf32>
    tpu.vector_store %arg11[%c0_15, %c17], %11 {strides = array<i32>} : memref<8x384xf32, #tpu.memory_space<vmem>>, vector<8x256xf32>,
    %c0_16 = arith.constant 0 : index
    %c0_17 = arith.constant 0 : index
    %13 = vector.load %arg3[%c0_16, %c0_17] : memref<8x72xf32, #tpu.memory_space<vmem>>, vector<8x72xf32>
    %c0_18 = arith.constant 0 : index
    %c0_19 = arith.constant 0 : index
    %14 = vector.load %arg4[%c0_18, %c0_19] : memref<8x1xf32, #tpu.memory_space<vmem>>, vector<8x1xf32>
    %c0_20 = arith.constant 0 : index
    %c0_21 = arith.constant 0 : index
    %15 = vector.load %arg11[%c0_20, %c0_21] : memref<8x384xf32, #tpu.memory_space<vmem>>, vector<8x256xf32>
    %16 = vector.broadcast %0 : vector<1x256xf32> to vector<8x256xf32>
    %17 = arith.mulf %15, %16 : vector<8x256xf32>
    %c0_22 = arith.constant 0 : index
    %c1_23 = arith.constant 1 : index
    %18 = vector.load %arg11[%c0_22, %c1_23] : memref<8x384xf32, #tpu.memory_space<vmem>>, vector<8x256xf32>
    %c0_24 = arith.constant 0 : index
    %c2 = arith.constant 2 : index
    %19 = vector.load %arg11[%c0_24, %c2] : memref<8x384xf32, #tpu.memory_space<vmem>>, vector<8x256xf32>
    %20 = vector.broadcast %1 : vector<1x256xf32> to vector<8x256xf32>
    %21 = arith.mulf %19, %20 : vector<8x256xf32>
    %c0_25 = arith.constant 0 : index
    %c16 = arith.constant 16 : index
    %22 = vector.load %arg11[%c0_25, %c16] : memref<8x384xf32, #tpu.memory_space<vmem>>, vector<8x256xf32>
    %23 = vector.broadcast %0 : vector<1x256xf32> to vector<8x256xf32>
    %24 = arith.mulf %22, %23 : vector<8x256xf32>
    %c0_26 = arith.constant 0 : index
    %c17_27 = arith.constant 17 : index
    %25 = vector.load %arg11[%c0_26, %c17_27] : memref<8x384xf32, #tpu.memory_space<vmem>>, vector<8x256xf32>
    %c0_28 = arith.constant 0 : index
    %c18 = arith.constant 18 : index
    %26 = vector.load %arg11[%c0_28, %c18] : memref<8x384xf32, #tpu.memory_space<vmem>>, vector<8x256xf32>
    %27 = vector.broadcast %1 : vector<1x256xf32> to vector<8x256xf32>
    %28 = arith.mulf %26, %27 : vector<8x256xf32>
    %c0_29 = arith.constant 0 : index
    %c32 = arith.constant 32 : index
    %29 = vector.load %arg11[%c0_29, %c32] : memref<8x384xf32, #tpu.memory_space<vmem>>, vector<8x256xf32>
    %30 = vector.broadcast %0 : vector<1x256xf32> to vector<8x256xf32>
    %31 = arith.mulf %29, %30 : vector<8x256xf32>
    %c0_30 = arith.constant 0 : index
    %c33 = arith.constant 33 : index
    %32 = vector.load %arg11[%c0_30, %c33] : memref<8x384xf32, #tpu.memory_space<vmem>>, vector<8x256xf32>
    %c0_31 = arith.constant 0 : index
    %c34 = arith.constant 34 : index
    %33 = vector.load %arg11[%c0_31, %c34] : memref<8x384xf32, #tpu.memory_space<vmem>>, vector<8x256xf32>
    %34 = vector.broadcast %1 : vector<1x256xf32> to vector<8x256xf32>
    %35 = arith.mulf %33, %34 : vector<8x256xf32>
    %36 = tpu.concatenate %17, %18, %21, %24, %25, %28, %31, %32, %35 in 0 : vector<8x256xf32>, vector<8x256xf32>, vector<8x256xf32>, vector<8x256xf32>, vector<8x256xf32>, vector<8x256xf32>, vector<8x256xf32>, vector<8x256xf32>, vector<8x256xf32> -> vector<72x256xf32>
    %cst_32 = arith.constant dense<0.000000e+00> : vector<8x256xf32>
    %37 = tpu.matmul %13, %36, %cst_32 {dimension_numbers = #tpu.dot_dimension_numbers<[1], [0], [0], [1], [0, 0, 1, 1], [], []>} : vector<8x72xf32>, vector<72x256xf32>, vector<8x256xf32> -> vector<8x256xf32>
    %38 = vector.broadcast %14 : vector<8x1xf32> to vector<8x256xf32>
    %39 = arith.addf %37, %38 : vector<8x256xf32>
    %cst_33 = arith.constant 0.000000e+00 : f32
    %40 = vector.broadcast %cst_33 : f32 to vector<8x256xf32>
    %41 = arith.cmpf ogt, %39, %40 : vector<8x256xf32>
    %cst_34 = arith.constant 2.000000e-01 : f32
    %42 = vector.broadcast %cst_34 : f32 to vector<8x256xf32>
    %43 = arith.mulf %42, %39 : vector<8x256xf32>
    %44 = arith.select %41, %39, %43 : vector<8x256xi1>, vector<8x256xf32>
    %c0_35 = arith.constant 0 : index
    %c17_36 = arith.constant 17 : index
    %45 = vector.load %arg12[%c0_35, %c17_36] : memref<8x384xf32, #tpu.memory_space<vmem>>, vector<8x256xf32>
    tpu.vector_store %arg12[%c0_35, %c17_36], %44 {strides = array<i32>} : memref<8x384xf32, #tpu.memory_space<vmem>>, vector<8x256xf32>,
    %c0_37 = arith.constant 0 : index
    %c0_38 = arith.constant 0 : index
    %c0_39 = arith.constant 0 : index
    %46 = vector.load %arg5[%c0_37, %c0_38, %c0_39] : memref<6x8x72xf32, #tpu.memory_space<vmem>>, vector<1x8x72xf32>
    %47 = vector.shape_cast %46 : vector<1x8x72xf32> to vector<8x72xf32>
    %c0_40 = arith.constant 0 : index
    %c0_41 = arith.constant 0 : index
    %c0_42 = arith.constant 0 : index
    %48 = vector.load %arg6[%c0_40, %c0_41, %c0_42] : memref<6x8x1xf32, #tpu.memory_space<vmem>>, vector<1x8x1xf32>
    %49 = vector.shape_cast %48 : vector<1x8x1xf32> to vector<8x1xf32>
    %c0_43 = arith.constant 0 : index
    %c0_44 = arith.constant 0 : index
    %50 = vector.load %arg12[%c0_43, %c0_44] : memref<8x384xf32, #tpu.memory_space<vmem>>, vector<8x256xf32>
    %51 = vector.broadcast %0 : vector<1x256xf32> to vector<8x256xf32>
    %52 = arith.mulf %50, %51 : vector<8x256xf32>
    %c0_45 = arith.constant 0 : index
    %c1_46 = arith.constant 1 : index
    %53 = vector.load %arg12[%c0_45, %c1_46] : memref<8x384xf32, #tpu.memory_space<vmem>>, vector<8x256xf32>
    %c0_47 = arith.constant 0 : index
    %c2_48 = arith.constant 2 : index
    %54 = vector.load %arg12[%c0_47, %c2_48] : memref<8x384xf32, #tpu.memory_space<vmem>>, vector<8x256xf32>
    %55 = vector.broadcast %1 : vector<1x256xf32> to vector<8x256xf32>
    %56 = arith.mulf %54, %55 : vector<8x256xf32>
    %c0_49 = arith.constant 0 : index
    %c16_50 = arith.constant 16 : index
    %57 = vector.load %arg12[%c0_49, %c16_50] : memref<8x384xf32, #tpu.memory_space<vmem>>, vector<8x256xf32>
    %58 = vector.broadcast %0 : vector<1x256xf32> to vector<8x256xf32>
    %59 = arith.mulf %57, %58 : vector<8x256xf32>
    %c0_51 = arith.constant 0 : index
    %c17_52 = arith.constant 17 : index
    %60 = vector.load %arg12[%c0_51, %c17_52] : memref<8x384xf32, #tpu.memory_space<vmem>>, vector<8x256xf32>
    %c0_53 = arith.constant 0 : index
    %c18_54 = arith.constant 18 : index
    %61 = vector.load %arg12[%c0_53, %c18_54] : memref<8x384xf32, #tpu.memory_space<vmem>>, vector<8x256xf32>
    %62 = vector.broadcast %1 : vector<1x256xf32> to vector<8x256xf32>
    %63 = arith.mulf %61, %62 : vector<8x256xf32>
    %c0_55 = arith.constant 0 : index
    %c32_56 = arith.constant 32 : index
    %64 = vector.load %arg12[%c0_55, %c32_56] : memref<8x384xf32, #tpu.memory_space<vmem>>, vector<8x256xf32>
    %65 = vector.broadcast %0 : vector<1x256xf32> to vector<8x256xf32>
    %66 = arith.mulf %64, %65 : vector<8x256xf32>
    %c0_57 = arith.constant 0 : index
    %c33_58 = arith.constant 33 : index
    %67 = vector.load %arg12[%c0_57, %c33_58] : memref<8x384xf32, #tpu.memory_space<vmem>>, vector<8x256xf32>
    %c0_59 = arith.constant 0 : index
    %c34_60 = arith.constant 34 : index
    %68 = vector.load %arg12[%c0_59, %c34_60] : memref<8x384xf32, #tpu.memory_space<vmem>>, vector<8x256xf32>
    %69 = vector.broadcast %1 : vector<1x256xf32> to vector<8x256xf32>
    %70 = arith.mulf %68, %69 : vector<8x256xf32>
    %71 = tpu.concatenate %52, %53, %56, %59, %60, %63, %66, %67, %70 in 0 : vector<8x256xf32>, vector<8x256xf32>, vector<8x256xf32>, vector<8x256xf32>, vector<8x256xf32>, vector<8x256xf32>, vector<8x256xf32>, vector<8x256xf32>, vector<8x256xf32> -> vector<72x256xf32>
    %cst_61 = arith.constant dense<0.000000e+00> : vector<8x256xf32>
    %72 = tpu.matmul %47, %71, %cst_61 {dimension_numbers = #tpu.dot_dimension_numbers<[1], [0], [0], [1], [0, 0, 1, 1], [], []>} : vector<8x72xf32>, vector<72x256xf32>, vector<8x256xf32> -> vector<8x256xf32>
    %73 = vector.broadcast %49 : vector<8x1xf32> to vector<8x256xf32>
    %74 = arith.addf %72, %73 : vector<8x256xf32>
    %cst_62 = arith.constant 0.000000e+00 : f32
    %75 = vector.broadcast %cst_62 : f32 to vector<8x256xf32>
    %76 = arith.cmpf ogt, %74, %75 : vector<8x256xf32>
    %cst_63 = arith.constant 2.000000e-01 : f32
    %77 = vector.broadcast %cst_63 : f32 to vector<8x256xf32>
    %78 = arith.mulf %77, %74 : vector<8x256xf32>
    %79 = arith.select %76, %74, %78 : vector<8x256xi1>, vector<8x256xf32>
    %c0_64 = arith.constant 0 : index
    %c17_65 = arith.constant 17 : index
    %80 = vector.load %arg12[%c0_64, %c17_65] : memref<8x384xf32, #tpu.memory_space<vmem>>, vector<8x256xf32>
    tpu.vector_store %arg12[%c0_64, %c17_65], %79 {strides = array<i32>} : memref<8x384xf32, #tpu.memory_space<vmem>>, vector<8x256xf32>,
    %c1_66 = arith.constant 1 : index
    %c0_67 = arith.constant 0 : index
    %c0_68 = arith.constant 0 : index
    %81 = vector.load %arg5[%c1_66, %c0_67, %c0_68] : memref<6x8x72xf32, #tpu.memory_space<vmem>>, vector<1x8x72xf32>
    %82 = vector.shape_cast %81 : vector<1x8x72xf32> to vector<8x72xf32>
    %c1_69 = arith.constant 1 : index
    %c0_70 = arith.constant 0 : index
    %c0_71 = arith.constant 0 : index
    %83 = vector.load %arg6[%c1_69, %c0_70, %c0_71] : memref<6x8x1xf32, #tpu.memory_space<vmem>>, vector<1x8x1xf32>
    %84 = vector.shape_cast %83 : vector<1x8x1xf32> to vector<8x1xf32>
    %c0_72 = arith.constant 0 : index
    %c0_73 = arith.constant 0 : index
    %85 = vector.load %arg12[%c0_72, %c0_73] : memref<8x384xf32, #tpu.memory_space<vmem>>, vector<8x256xf32>
    %86 = vector.broadcast %0 : vector<1x256xf32> to vector<8x256xf32>
    %87 = arith.mulf %85, %86 : vector<8x256xf32>
    %c0_74 = arith.constant 0 : index
    %c1_75 = arith.constant 1 : index
    %88 = vector.load %arg12[%c0_74, %c1_75] : memref<8x384xf32, #tpu.memory_space<vmem>>, vector<8x256xf32>
    %c0_76 = arith.constant 0 : index
    %c2_77 = arith.constant 2 : index
    %89 = vector.load %arg12[%c0_76, %c2_77] : memref<8x384xf32, #tpu.memory_space<vmem>>, vector<8x256xf32>
    %90 = vector.broadcast %1 : vector<1x256xf32> to vector<8x256xf32>
    %91 = arith.mulf %89, %90 : vector<8x256xf32>
    %c0_78 = arith.constant 0 : index
    %c16_79 = arith.constant 16 : index
    %92 = vector.load %arg12[%c0_78, %c16_79] : memref<8x384xf32, #tpu.memory_space<vmem>>, vector<8x256xf32>
    %93 = vector.broadcast %0 : vector<1x256xf32> to vector<8x256xf32>
    %94 = arith.mulf %92, %93 : vector<8x256xf32>
    %c0_80 = arith.constant 0 : index
    %c17_81 = arith.constant 17 : index
    %95 = vector.load %arg12[%c0_80, %c17_81] : memref<8x384xf32, #tpu.memory_space<vmem>>, vector<8x256xf32>
    %c0_82 = arith.constant 0 : index
    %c18_83 = arith.constant 18 : index
    %96 = vector.load %arg12[%c0_82, %c18_83] : memref<8x384xf32, #tpu.memory_space<vmem>>, vector<8x256xf32>
    %97 = vector.broadcast %1 : vector<1x256xf32> to vector<8x256xf32>
    %98 = arith.mulf %96, %97 : vector<8x256xf32>
    %c0_84 = arith.constant 0 : index
    %c32_85 = arith.constant 32 : index
    %99 = vector.load %arg12[%c0_84, %c32_85] : memref<8x384xf32, #tpu.memory_space<vmem>>, vector<8x256xf32>
    %100 = vector.broadcast %0 : vector<1x256xf32> to vector<8x256xf32>
    %101 = arith.mulf %99, %100 : vector<8x256xf32>
    %c0_86 = arith.constant 0 : index
    %c33_87 = arith.constant 33 : index
    %102 = vector.load %arg12[%c0_86, %c33_87] : memref<8x384xf32, #tpu.memory_space<vmem>>, vector<8x256xf32>
    %c0_88 = arith.constant 0 : index
    %c34_89 = arith.constant 34 : index
    %103 = vector.load %arg12[%c0_88, %c34_89] : memref<8x384xf32, #tpu.memory_space<vmem>>, vector<8x256xf32>
    %104 = vector.broadcast %1 : vector<1x256xf32> to vector<8x256xf32>
    %105 = arith.mulf %103, %104 : vector<8x256xf32>
    %106 = tpu.concatenate %87, %88, %91, %94, %95, %98, %101, %102, %105 in 0 : vector<8x256xf32>, vector<8x256xf32>, vector<8x256xf32>, vector<8x256xf32>, vector<8x256xf32>, vector<8x256xf32>, vector<8x256xf32>, vector<8x256xf32>, vector<8x256xf32> -> vector<72x256xf32>
    %cst_90 = arith.constant dense<0.000000e+00> : vector<8x256xf32>
    %107 = tpu.matmul %82, %106, %cst_90 {dimension_numbers = #tpu.dot_dimension_numbers<[1], [0], [0], [1], [0, 0, 1, 1], [], []>} : vector<8x72xf32>, vector<72x256xf32>, vector<8x256xf32> -> vector<8x256xf32>
    %108 = vector.broadcast %84 : vector<8x1xf32> to vector<8x256xf32>
    %109 = arith.addf %107, %108 : vector<8x256xf32>
    %110 = arith.addf %109, %44 : vector<8x256xf32>
    %cst_91 = arith.constant 0.000000e+00 : f32
    %111 = vector.broadcast %cst_91 : f32 to vector<8x256xf32>
    %112 = arith.cmpf ogt, %110, %111 : vector<8x256xf32>
    %cst_92 = arith.constant 2.000000e-01 : f32
    %113 = vector.broadcast %cst_92 : f32 to vector<8x256xf32>
    %114 = arith.mulf %113, %110 : vector<8x256xf32>
    %115 = arith.select %112, %110, %114 : vector<8x256xi1>, vector<8x256xf32>
    %c0_93 = arith.constant 0 : index
    %c17_94 = arith.constant 17 : index
    %116 = vector.load %arg12[%c0_93, %c17_94] : memref<8x384xf32, #tpu.memory_space<vmem>>, vector<8x256xf32>
    tpu.vector_store %arg12[%c0_93, %c17_94], %115 {strides = array<i32>} : memref<8x384xf32, #tpu.memory_space<vmem>>, vector<8x256xf32>,
    %c2_95 = arith.constant 2 : index
    %c0_96 = arith.constant 0 : index
    %c0_97 = arith.constant 0 : index
    %117 = vector.load %arg5[%c2_95, %c0_96, %c0_97] : memref<6x8x72xf32, #tpu.memory_space<vmem>>, vector<1x8x72xf32>
    %118 = vector.shape_cast %117 : vector<1x8x72xf32> to vector<8x72xf32>
    %c2_98 = arith.constant 2 : index
    %c0_99 = arith.constant 0 : index
    %c0_100 = arith.constant 0 : index
    %119 = vector.load %arg6[%c2_98, %c0_99, %c0_100] : memref<6x8x1xf32, #tpu.memory_space<vmem>>, vector<1x8x1xf32>
    %120 = vector.shape_cast %119 : vector<1x8x1xf32> to vector<8x1xf32>
    %c0_101 = arith.constant 0 : index
    %c0_102 = arith.constant 0 : index
    %121 = vector.load %arg12[%c0_101, %c0_102] : memref<8x384xf32, #tpu.memory_space<vmem>>, vector<8x256xf32>
    %122 = vector.broadcast %0 : vector<1x256xf32> to vector<8x256xf32>
    %123 = arith.mulf %121, %122 : vector<8x256xf32>
    %c0_103 = arith.constant 0 : index
    %c1_104 = arith.constant 1 : index
    %124 = vector.load %arg12[%c0_103, %c1_104] : memref<8x384xf32, #tpu.memory_space<vmem>>, vector<8x256xf32>
    %c0_105 = arith.constant 0 : index
    %c2_106 = arith.constant 2 : index
    %125 = vector.load %arg12[%c0_105, %c2_106] : memref<8x384xf32, #tpu.memory_space<vmem>>, vector<8x256xf32>
    %126 = vector.broadcast %1 : vector<1x256xf32> to vector<8x256xf32>
    %127 = arith.mulf %125, %126 : vector<8x256xf32>
    %c0_107 = arith.constant 0 : index
    %c16_108 = arith.constant 16 : index
    %128 = vector.load %arg12[%c0_107, %c16_108] : memref<8x384xf32, #tpu.memory_space<vmem>>, vector<8x256xf32>
    %129 = vector.broadcast %0 : vector<1x256xf32> to vector<8x256xf32>
    %130 = arith.mulf %128, %129 : vector<8x256xf32>
    %c0_109 = arith.constant 0 : index
    %c17_110 = arith.constant 17 : index
    %131 = vector.load %arg12[%c0_109, %c17_110] : memref<8x384xf32, #tpu.memory_space<vmem>>, vector<8x256xf32>
    %c0_111 = arith.constant 0 : index
    %c18_112 = arith.constant 18 : index
    %132 = vector.load %arg12[%c0_111, %c18_112] : memref<8x384xf32, #tpu.memory_space<vmem>>, vector<8x256xf32>
    %133 = vector.broadcast %1 : vector<1x256xf32> to vector<8x256xf32>
    %134 = arith.mulf %132, %133 : vector<8x256xf32>
    %c0_113 = arith.constant 0 : index
    %c32_114 = arith.constant 32 : index
    %135 = vector.load %arg12[%c0_113, %c32_114] : memref<8x384xf32, #tpu.memory_space<vmem>>, vector<8x256xf32>
    %136 = vector.broadcast %0 : vector<1x256xf32> to vector<8x256xf32>
    %137 = arith.mulf %135, %136 : vector<8x256xf32>
    %c0_115 = arith.constant 0 : index
    %c33_116 = arith.constant 33 : index
    %138 = vector.load %arg12[%c0_115, %c33_116] : memref<8x384xf32, #tpu.memory_space<vmem>>, vector<8x256xf32>
    %c0_117 = arith.constant 0 : index
    %c34_118 = arith.constant 34 : index
    %139 = vector.load %arg12[%c0_117, %c34_118] : memref<8x384xf32, #tpu.memory_space<vmem>>, vector<8x256xf32>
    %140 = vector.broadcast %1 : vector<1x256xf32> to vector<8x256xf32>
    %141 = arith.mulf %139, %140 : vector<8x256xf32>
    %142 = tpu.concatenate %123, %124, %127, %130, %131, %134, %137, %138, %141 in 0 : vector<8x256xf32>, vector<8x256xf32>, vector<8x256xf32>, vector<8x256xf32>, vector<8x256xf32>, vector<8x256xf32>, vector<8x256xf32>, vector<8x256xf32>, vector<8x256xf32> -> vector<72x256xf32>
    %cst_119 = arith.constant dense<0.000000e+00> : vector<8x256xf32>
    %143 = tpu.matmul %118, %142, %cst_119 {dimension_numbers = #tpu.dot_dimension_numbers<[1], [0], [0], [1], [0, 0, 1, 1], [], []>} : vector<8x72xf32>, vector<72x256xf32>, vector<8x256xf32> -> vector<8x256xf32>
    %144 = vector.broadcast %120 : vector<8x1xf32> to vector<8x256xf32>
    %145 = arith.addf %143, %144 : vector<8x256xf32>
    %cst_120 = arith.constant 0.000000e+00 : f32
    %146 = vector.broadcast %cst_120 : f32 to vector<8x256xf32>
    %147 = arith.cmpf ogt, %145, %146 : vector<8x256xf32>
    %cst_121 = arith.constant 2.000000e-01 : f32
    %148 = vector.broadcast %cst_121 : f32 to vector<8x256xf32>
    %149 = arith.mulf %148, %145 : vector<8x256xf32>
    %150 = arith.select %147, %145, %149 : vector<8x256xi1>, vector<8x256xf32>
    %c0_122 = arith.constant 0 : index
    %c17_123 = arith.constant 17 : index
    %151 = vector.load %arg12[%c0_122, %c17_123] : memref<8x384xf32, #tpu.memory_space<vmem>>, vector<8x256xf32>
    tpu.vector_store %arg12[%c0_122, %c17_123], %150 {strides = array<i32>} : memref<8x384xf32, #tpu.memory_space<vmem>>, vector<8x256xf32>,
    %c3 = arith.constant 3 : index
    %c0_124 = arith.constant 0 : index
    %c0_125 = arith.constant 0 : index
    %152 = vector.load %arg5[%c3, %c0_124, %c0_125] : memref<6x8x72xf32, #tpu.memory_space<vmem>>, vector<1x8x72xf32>
    %153 = vector.shape_cast %152 : vector<1x8x72xf32> to vector<8x72xf32>
    %c3_126 = arith.constant 3 : index
    %c0_127 = arith.constant 0 : index
    %c0_128 = arith.constant 0 : index
    %154 = vector.load %arg6[%c3_126, %c0_127, %c0_128] : memref<6x8x1xf32, #tpu.memory_space<vmem>>, vector<1x8x1xf32>
    %155 = vector.shape_cast %154 : vector<1x8x1xf32> to vector<8x1xf32>
    %c0_129 = arith.constant 0 : index
    %c0_130 = arith.constant 0 : index
    %156 = vector.load %arg12[%c0_129, %c0_130] : memref<8x384xf32, #tpu.memory_space<vmem>>, vector<8x256xf32>
    %157 = vector.broadcast %0 : vector<1x256xf32> to vector<8x256xf32>
    %158 = arith.mulf %156, %157 : vector<8x256xf32>
    %c0_131 = arith.constant 0 : index
    %c1_132 = arith.constant 1 : index
    %159 = vector.load %arg12[%c0_131, %c1_132] : memref<8x384xf32, #tpu.memory_space<vmem>>, vector<8x256xf32>
    %c0_133 = arith.constant 0 : index
    %c2_134 = arith.constant 2 : index
    %160 = vector.load %arg12[%c0_133, %c2_134] : memref<8x384xf32, #tpu.memory_space<vmem>>, vector<8x256xf32>
    %161 = vector.broadcast %1 : vector<1x256xf32> to vector<8x256xf32>
    %162 = arith.mulf %160, %161 : vector<8x256xf32>
    %c0_135 = arith.constant 0 : index
    %c16_136 = arith.constant 16 : index
    %163 = vector.load %arg12[%c0_135, %c16_136] : memref<8x384xf32, #tpu.memory_space<vmem>>, vector<8x256xf32>
    %164 = vector.broadcast %0 : vector<1x256xf32> to vector<8x256xf32>
    %165 = arith.mulf %163, %164 : vector<8x256xf32>
    %c0_137 = arith.constant 0 : index
    %c17_138 = arith.constant 17 : index
    %166 = vector.load %arg12[%c0_137, %c17_138] : memref<8x384xf32, #tpu.memory_space<vmem>>, vector<8x256xf32>
    %c0_139 = arith.constant 0 : index
    %c18_140 = arith.constant 18 : index
    %167 = vector.load %arg12[%c0_139, %c18_140] : memref<8x384xf32, #tpu.memory_space<vmem>>, vector<8x256xf32>
    %168 = vector.broadcast %1 : vector<1x256xf32> to vector<8x256xf32>
    %169 = arith.mulf %167, %168 : vector<8x256xf32>
    %c0_141 = arith.constant 0 : index
    %c32_142 = arith.constant 32 : index
    %170 = vector.load %arg12[%c0_141, %c32_142] : memref<8x384xf32, #tpu.memory_space<vmem>>, vector<8x256xf32>
    %171 = vector.broadcast %0 : vector<1x256xf32> to vector<8x256xf32>
    %172 = arith.mulf %170, %171 : vector<8x256xf32>
    %c0_143 = arith.constant 0 : index
    %c33_144 = arith.constant 33 : index
    %173 = vector.load %arg12[%c0_143, %c33_144] : memref<8x384xf32, #tpu.memory_space<vmem>>, vector<8x256xf32>
    %c0_145 = arith.constant 0 : index
    %c34_146 = arith.constant 34 : index
    %174 = vector.load %arg12[%c0_145, %c34_146] : memref<8x384xf32, #tpu.memory_space<vmem>>, vector<8x256xf32>
    %175 = vector.broadcast %1 : vector<1x256xf32> to vector<8x256xf32>
    %176 = arith.mulf %174, %175 : vector<8x256xf32>
    %177 = tpu.concatenate %158, %159, %162, %165, %166, %169, %172, %173, %176 in 0 : vector<8x256xf32>, vector<8x256xf32>, vector<8x256xf32>, vector<8x256xf32>, vector<8x256xf32>, vector<8x256xf32>, vector<8x256xf32>, vector<8x256xf32>, vector<8x256xf32> -> vector<72x256xf32>
    %cst_147 = arith.constant dense<0.000000e+00> : vector<8x256xf32>
    %178 = tpu.matmul %153, %177, %cst_147 {dimension_numbers = #tpu.dot_dimension_numbers<[1], [0], [0], [1], [0, 0, 1, 1], [], []>} : vector<8x72xf32>, vector<72x256xf32>, vector<8x256xf32> -> vector<8x256xf32>
    %179 = vector.broadcast %155 : vector<8x1xf32> to vector<8x256xf32>
    %180 = arith.addf %178, %179 : vector<8x256xf32>
    %181 = arith.addf %180, %115 : vector<8x256xf32>
    %cst_148 = arith.constant 0.000000e+00 : f32
    %182 = vector.broadcast %cst_148 : f32 to vector<8x256xf32>
    %183 = arith.cmpf ogt, %181, %182 : vector<8x256xf32>
    %cst_149 = arith.constant 2.000000e-01 : f32
    %184 = vector.broadcast %cst_149 : f32 to vector<8x256xf32>
    %185 = arith.mulf %184, %181 : vector<8x256xf32>
    %186 = arith.select %183, %181, %185 : vector<8x256xi1>, vector<8x256xf32>
    %c0_150 = arith.constant 0 : index
    %c17_151 = arith.constant 17 : index
    %187 = vector.load %arg12[%c0_150, %c17_151] : memref<8x384xf32, #tpu.memory_space<vmem>>, vector<8x256xf32>
    tpu.vector_store %arg12[%c0_150, %c17_151], %186 {strides = array<i32>} : memref<8x384xf32, #tpu.memory_space<vmem>>, vector<8x256xf32>,
    %c4 = arith.constant 4 : index
    %c0_152 = arith.constant 0 : index
    %c0_153 = arith.constant 0 : index
    %188 = vector.load %arg5[%c4, %c0_152, %c0_153] : memref<6x8x72xf32, #tpu.memory_space<vmem>>, vector<1x8x72xf32>
    %189 = vector.shape_cast %188 : vector<1x8x72xf32> to vector<8x72xf32>
    %c4_154 = arith.constant 4 : index
    %c0_155 = arith.constant 0 : index
    %c0_156 = arith.constant 0 : index
    %190 = vector.load %arg6[%c4_154, %c0_155, %c0_156] : memref<6x8x1xf32, #tpu.memory_space<vmem>>, vector<1x8x1xf32>
    %191 = vector.shape_cast %190 : vector<1x8x1xf32> to vector<8x1xf32>
    %c0_157 = arith.constant 0 : index
    %c0_158 = arith.constant 0 : index
    %192 = vector.load %arg12[%c0_157, %c0_158] : memref<8x384xf32, #tpu.memory_space<vmem>>, vector<8x256xf32>
    %193 = vector.broadcast %0 : vector<1x256xf32> to vector<8x256xf32>
    %194 = arith.mulf %192, %193 : vector<8x256xf32>
    %c0_159 = arith.constant 0 : index
    %c1_160 = arith.constant 1 : index
    %195 = vector.load %arg12[%c0_159, %c1_160] : memref<8x384xf32, #tpu.memory_space<vmem>>, vector<8x256xf32>
    %c0_161 = arith.constant 0 : index
    %c2_162 = arith.constant 2 : index
    %196 = vector.load %arg12[%c0_161, %c2_162] : memref<8x384xf32, #tpu.memory_space<vmem>>, vector<8x256xf32>
    %197 = vector.broadcast %1 : vector<1x256xf32> to vector<8x256xf32>
    %198 = arith.mulf %196, %197 : vector<8x256xf32>
    %c0_163 = arith.constant 0 : index
    %c16_164 = arith.constant 16 : index
    %199 = vector.load %arg12[%c0_163, %c16_164] : memref<8x384xf32, #tpu.memory_space<vmem>>, vector<8x256xf32>
    %200 = vector.broadcast %0 : vector<1x256xf32> to vector<8x256xf32>
    %201 = arith.mulf %199, %200 : vector<8x256xf32>
    %c0_165 = arith.constant 0 : index
    %c17_166 = arith.constant 17 : index
    %202 = vector.load %arg12[%c0_165, %c17_166] : memref<8x384xf32, #tpu.memory_space<vmem>>, vector<8x256xf32>
    %c0_167 = arith.constant 0 : index
    %c18_168 = arith.constant 18 : index
    %203 = vector.load %arg12[%c0_167, %c18_168] : memref<8x384xf32, #tpu.memory_space<vmem>>, vector<8x256xf32>
    %204 = vector.broadcast %1 : vector<1x256xf32> to vector<8x256xf32>
    %205 = arith.mulf %203, %204 : vector<8x256xf32>
    %c0_169 = arith.constant 0 : index
    %c32_170 = arith.constant 32 : index
    %206 = vector.load %arg12[%c0_169, %c32_170] : memref<8x384xf32, #tpu.memory_space<vmem>>, vector<8x256xf32>
    %207 = vector.broadcast %0 : vector<1x256xf32> to vector<8x256xf32>
    %208 = arith.mulf %206, %207 : vector<8x256xf32>
    %c0_171 = arith.constant 0 : index
    %c33_172 = arith.constant 33 : index
    %209 = vector.load %arg12[%c0_171, %c33_172] : memref<8x384xf32, #tpu.memory_space<vmem>>, vector<8x256xf32>
    %c0_173 = arith.constant 0 : index
    %c34_174 = arith.constant 34 : index
    %210 = vector.load %arg12[%c0_173, %c34_174] : memref<8x384xf32, #tpu.memory_space<vmem>>, vector<8x256xf32>
    %211 = vector.broadcast %1 : vector<1x256xf32> to vector<8x256xf32>
    %212 = arith.mulf %210, %211 : vector<8x256xf32>
    %213 = tpu.concatenate %194, %195, %198, %201, %202, %205, %208, %209, %212 in 0 : vector<8x256xf32>, vector<8x256xf32>, vector<8x256xf32>, vector<8x256xf32>, vector<8x256xf32>, vector<8x256xf32>, vector<8x256xf32>, vector<8x256xf32>, vector<8x256xf32> -> vector<72x256xf32>
    %cst_175 = arith.constant dense<0.000000e+00> : vector<8x256xf32>
    %214 = tpu.matmul %189, %213, %cst_175 {dimension_numbers = #tpu.dot_dimension_numbers<[1], [0], [0], [1], [0, 0, 1, 1], [], []>} : vector<8x72xf32>, vector<72x256xf32>, vector<8x256xf32> -> vector<8x256xf32>
    %215 = vector.broadcast %191 : vector<8x1xf32> to vector<8x256xf32>
    %216 = arith.addf %214, %215 : vector<8x256xf32>
    %cst_176 = arith.constant 0.000000e+00 : f32
    %217 = vector.broadcast %cst_176 : f32 to vector<8x256xf32>
    %218 = arith.cmpf ogt, %216, %217 : vector<8x256xf32>
    %cst_177 = arith.constant 2.000000e-01 : f32
    %219 = vector.broadcast %cst_177 : f32 to vector<8x256xf32>
    %220 = arith.mulf %219, %216 : vector<8x256xf32>
    %221 = arith.select %218, %216, %220 : vector<8x256xi1>, vector<8x256xf32>
    %c0_178 = arith.constant 0 : index
    %c17_179 = arith.constant 17 : index
    %222 = vector.load %arg12[%c0_178, %c17_179] : memref<8x384xf32, #tpu.memory_space<vmem>>, vector<8x256xf32>
    tpu.vector_store %arg12[%c0_178, %c17_179], %221 {strides = array<i32>} : memref<8x384xf32, #tpu.memory_space<vmem>>, vector<8x256xf32>,
    %c5 = arith.constant 5 : index
    %c0_180 = arith.constant 0 : index
    %c0_181 = arith.constant 0 : index
    %223 = vector.load %arg5[%c5, %c0_180, %c0_181] : memref<6x8x72xf32, #tpu.memory_space<vmem>>, vector<1x8x72xf32>
    %224 = vector.shape_cast %223 : vector<1x8x72xf32> to vector<8x72xf32>
    %c5_182 = arith.constant 5 : index
    %c0_183 = arith.constant 0 : index
    %c0_184 = arith.constant 0 : index
    %225 = vector.load %arg6[%c5_182, %c0_183, %c0_184] : memref<6x8x1xf32, #tpu.memory_space<vmem>>, vector<1x8x1xf32>
    %226 = vector.shape_cast %225 : vector<1x8x1xf32> to vector<8x1xf32>
    %c0_185 = arith.constant 0 : index
    %c0_186 = arith.constant 0 : index
    %227 = vector.load %arg12[%c0_185, %c0_186] : memref<8x384xf32, #tpu.memory_space<vmem>>, vector<8x256xf32>
    %228 = vector.broadcast %0 : vector<1x256xf32> to vector<8x256xf32>
    %229 = arith.mulf %227, %228 : vector<8x256xf32>
    %c0_187 = arith.constant 0 : index
    %c1_188 = arith.constant 1 : index
    %230 = vector.load %arg12[%c0_187, %c1_188] : memref<8x384xf32, #tpu.memory_space<vmem>>, vector<8x256xf32>
    %c0_189 = arith.constant 0 : index
    %c2_190 = arith.constant 2 : index
    %231 = vector.load %arg12[%c0_189, %c2_190] : memref<8x384xf32, #tpu.memory_space<vmem>>, vector<8x256xf32>
    %232 = vector.broadcast %1 : vector<1x256xf32> to vector<8x256xf32>
    %233 = arith.mulf %231, %232 : vector<8x256xf32>
    %c0_191 = arith.constant 0 : index
    %c16_192 = arith.constant 16 : index
    %234 = vector.load %arg12[%c0_191, %c16_192] : memref<8x384xf32, #tpu.memory_space<vmem>>, vector<8x256xf32>
    %235 = vector.broadcast %0 : vector<1x256xf32> to vector<8x256xf32>
    %236 = arith.mulf %234, %235 : vector<8x256xf32>
    %c0_193 = arith.constant 0 : index
    %c17_194 = arith.constant 17 : index
    %237 = vector.load %arg12[%c0_193, %c17_194] : memref<8x384xf32, #tpu.memory_space<vmem>>, vector<8x256xf32>
    %c0_195 = arith.constant 0 : index
    %c18_196 = arith.constant 18 : index
    %238 = vector.load %arg12[%c0_195, %c18_196] : memref<8x384xf32, #tpu.memory_space<vmem>>, vector<8x256xf32>
    %239 = vector.broadcast %1 : vector<1x256xf32> to vector<8x256xf32>
    %240 = arith.mulf %238, %239 : vector<8x256xf32>
    %c0_197 = arith.constant 0 : index
    %c32_198 = arith.constant 32 : index
    %241 = vector.load %arg12[%c0_197, %c32_198] : memref<8x384xf32, #tpu.memory_space<vmem>>, vector<8x256xf32>
    %242 = vector.broadcast %0 : vector<1x256xf32> to vector<8x256xf32>
    %243 = arith.mulf %241, %242 : vector<8x256xf32>
    %c0_199 = arith.constant 0 : index
    %c33_200 = arith.constant 33 : index
    %244 = vector.load %arg12[%c0_199, %c33_200] : memref<8x384xf32, #tpu.memory_space<vmem>>, vector<8x256xf32>
    %c0_201 = arith.constant 0 : index
    %c34_202 = arith.constant 34 : index
    %245 = vector.load %arg12[%c0_201, %c34_202] : memref<8x384xf32, #tpu.memory_space<vmem>>, vector<8x256xf32>
    %246 = vector.broadcast %1 : vector<1x256xf32> to vector<8x256xf32>
    %247 = arith.mulf %245, %246 : vector<8x256xf32>
    %248 = tpu.concatenate %229, %230, %233, %236, %237, %240, %243, %244, %247 in 0 : vector<8x256xf32>, vector<8x256xf32>, vector<8x256xf32>, vector<8x256xf32>, vector<8x256xf32>, vector<8x256xf32>, vector<8x256xf32>, vector<8x256xf32>, vector<8x256xf32> -> vector<72x256xf32>
    %cst_203 = arith.constant dense<0.000000e+00> : vector<8x256xf32>
    %249 = tpu.matmul %224, %248, %cst_203 {dimension_numbers = #tpu.dot_dimension_numbers<[1], [0], [0], [1], [0, 0, 1, 1], [], []>} : vector<8x72xf32>, vector<72x256xf32>, vector<8x256xf32> -> vector<8x256xf32>
    %250 = vector.broadcast %226 : vector<8x1xf32> to vector<8x256xf32>
    %251 = arith.addf %249, %250 : vector<8x256xf32>
    %252 = arith.addf %251, %186 : vector<8x256xf32>
    %cst_204 = arith.constant 0.000000e+00 : f32
    %253 = vector.broadcast %cst_204 : f32 to vector<8x256xf32>
    %254 = arith.cmpf ogt, %252, %253 : vector<8x256xf32>
    %cst_205 = arith.constant 2.000000e-01 : f32
    %255 = vector.broadcast %cst_205 : f32 to vector<8x256xf32>
    %256 = arith.mulf %255, %252 : vector<8x256xf32>
    %257 = arith.select %254, %252, %256 : vector<8x256xi1>, vector<8x256xf32>
    %c0_206 = arith.constant 0 : index
    %c0_207 = arith.constant 0 : index
    %c0_208 = arith.constant 0 : index
    %258 = vector.load %arg10[%c0_206, %c0_207, %c0_208] : memref<1x8x256xf32, #tpu.memory_space<vmem>>, vector<1x8x256xf32>
    %259 = vector.shape_cast %258 : vector<1x8x256xf32> to vector<8x256xf32>
    %260 = vector.shape_cast %257 : vector<8x256xf32> to vector<1x8x256xf32>
    tpu.vector_store %arg10[%c0_206, %c0_207, %c0_208], %260 {strides = array<i32>} : memref<1x8x256xf32, #tpu.memory_space<vmem>>, vector<1x8x256xf32>,
    %c0_209 = arith.constant 0 : index
    %c17_210 = arith.constant 17 : index
    %261 = vector.load %arg12[%c0_209, %c17_210] : memref<8x384xf32, #tpu.memory_space<vmem>>, vector<8x256xf32>
    tpu.vector_store %arg12[%c0_209, %c17_210], %257 {strides = array<i32>} : memref<8x384xf32, #tpu.memory_space<vmem>>, vector<8x256xf32>,
    %c0_211 = arith.constant 0 : index
    %c0_212 = arith.constant 0 : index
    %262 = vector.load %arg7[%c0_211, %c0_212] : memref<16x72xf32, #tpu.memory_space<vmem>>, vector<16x72xf32>
    %c0_213 = arith.constant 0 : index
    %c0_214 = arith.constant 0 : index
    %263 = vector.load %arg8[%c0_213, %c0_214] : memref<16x1xf32, #tpu.memory_space<vmem>>, vector<16x1xf32>
    %c0_215 = arith.constant 0 : index
    %c0_216 = arith.constant 0 : index
    %264 = vector.load %arg12[%c0_215, %c0_216] : memref<8x384xf32, #tpu.memory_space<vmem>>, vector<8x256xf32>
    %265 = vector.broadcast %0 : vector<1x256xf32> to vector<8x256xf32>
    %266 = arith.mulf %264, %265 : vector<8x256xf32>
    %c0_217 = arith.constant 0 : index
    %c1_218 = arith.constant 1 : index
    %267 = vector.load %arg12[%c0_217, %c1_218] : memref<8x384xf32, #tpu.memory_space<vmem>>, vector<8x256xf32>
    %c0_219 = arith.constant 0 : index
    %c2_220 = arith.constant 2 : index
    %268 = vector.load %arg12[%c0_219, %c2_220] : memref<8x384xf32, #tpu.memory_space<vmem>>, vector<8x256xf32>
    %269 = vector.broadcast %1 : vector<1x256xf32> to vector<8x256xf32>
    %270 = arith.mulf %268, %269 : vector<8x256xf32>
    %c0_221 = arith.constant 0 : index
    %c16_222 = arith.constant 16 : index
    %271 = vector.load %arg12[%c0_221, %c16_222] : memref<8x384xf32, #tpu.memory_space<vmem>>, vector<8x256xf32>
    %272 = vector.broadcast %0 : vector<1x256xf32> to vector<8x256xf32>
    %273 = arith.mulf %271, %272 : vector<8x256xf32>
    %c0_223 = arith.constant 0 : index
    %c17_224 = arith.constant 17 : index
    %274 = vector.load %arg12[%c0_223, %c17_224] : memref<8x384xf32, #tpu.memory_space<vmem>>, vector<8x256xf32>
    %c0_225 = arith.constant 0 : index
    %c18_226 = arith.constant 18 : index
    %275 = vector.load %arg12[%c0_225, %c18_226] : memref<8x384xf32, #tpu.memory_space<vmem>>, vector<8x256xf32>
    %276 = vector.broadcast %1 : vector<1x256xf32> to vector<8x256xf32>
    %277 = arith.mulf %275, %276 : vector<8x256xf32>
    %c0_227 = arith.constant 0 : index
    %c32_228 = arith.constant 32 : index
    %278 = vector.load %arg12[%c0_227, %c32_228] : memref<8x384xf32, #tpu.memory_space<vmem>>, vector<8x256xf32>
    %279 = vector.broadcast %0 : vector<1x256xf32> to vector<8x256xf32>
    %280 = arith.mulf %278, %279 : vector<8x256xf32>
    %c0_229 = arith.constant 0 : index
    %c33_230 = arith.constant 33 : index
    %281 = vector.load %arg12[%c0_229, %c33_230] : memref<8x384xf32, #tpu.memory_space<vmem>>, vector<8x256xf32>
    %c0_231 = arith.constant 0 : index
    %c34_232 = arith.constant 34 : index
    %282 = vector.load %arg12[%c0_231, %c34_232] : memref<8x384xf32, #tpu.memory_space<vmem>>, vector<8x256xf32>
    %283 = vector.broadcast %1 : vector<1x256xf32> to vector<8x256xf32>
    %284 = arith.mulf %282, %283 : vector<8x256xf32>
    %285 = tpu.concatenate %266, %267, %270, %273, %274, %277, %280, %281, %284 in 0 : vector<8x256xf32>, vector<8x256xf32>, vector<8x256xf32>, vector<8x256xf32>, vector<8x256xf32>, vector<8x256xf32>, vector<8x256xf32>, vector<8x256xf32>, vector<8x256xf32> -> vector<72x256xf32>
    %cst_233 = arith.constant dense<0.000000e+00> : vector<16x256xf32>
    %286 = tpu.matmul %262, %285, %cst_233 {dimension_numbers = #tpu.dot_dimension_numbers<[1], [0], [0], [1], [0, 0, 1, 1], [], []>} : vector<16x72xf32>, vector<72x256xf32>, vector<16x256xf32> -> vector<16x256xf32>
    %287 = vector.broadcast %263 : vector<16x1xf32> to vector<16x256xf32>
    %288 = arith.addf %286, %287 : vector<16x256xf32>
    %cst_234 = arith.constant 0.000000e+00 : f32
    %289 = vector.broadcast %cst_234 : f32 to vector<16x256xf32>
    %290 = arith.cmpf ogt, %288, %289 : vector<16x256xf32>
    %cst_235 = arith.constant 2.000000e-01 : f32
    %291 = vector.broadcast %cst_235 : f32 to vector<16x256xf32>
    %292 = arith.mulf %291, %288 : vector<16x256xf32>
    %293 = arith.select %290, %288, %292 : vector<16x256xi1>, vector<16x256xf32>
    %c0_236 = arith.constant 0 : index
    %c0_237 = arith.constant 0 : index
    %c0_238 = arith.constant 0 : index
    %294 = vector.load %arg9[%c0_236, %c0_237, %c0_238] : memref<1x16x256xf32, #tpu.memory_space<vmem>>, vector<1x16x256xf32>
    %295 = vector.shape_cast %294 : vector<1x16x256xf32> to vector<16x256xf32>
    %296 = vector.shape_cast %293 : vector<16x256xf32> to vector<1x16x256xf32>
    tpu.vector_store %arg9[%c0_236, %c0_237, %c0_238], %296 {strides = array<i32>} : memref<1x16x256xf32, #tpu.memory_space<vmem>>, vector<1x16x256xf32>,
    return
  }
  func.func @transform_0(%arg0: i32) -> (i32, i32, i32) {
    %c0_i32 = arith.constant 0 : i32
    %c0_i32_0 = arith.constant 0 : i32
    %c0_i32_1 = arith.constant 0 : i32
    return %arg0, %c0_i32, %c0_i32_0 : i32, i32, i32
  }
  func.func @transform_1(%arg0: i32) -> (i32, i32) {
    %c0_i32 = arith.constant 0 : i32
    %c0_i32_0 = arith.constant 0 : i32
    %c0_i32_1 = arith.constant 0 : i32
    return %c0_i32, %c0_i32_0 : i32, i32
  }
  func.func @transform_2(%arg0: i32) -> (i32, i32) {
    %c0_i32 = arith.constant 0 : i32
    %c0_i32_0 = arith.constant 0 : i32
    %c0_i32_1 = arith.constant 0 : i32
    return %c0_i32, %c0_i32_0 : i32, i32
  }
  func.func @transform_3(%arg0: i32) -> (i32, i32) {
    %c0_i32 = arith.constant 0 : i32
    %c0_i32_0 = arith.constant 0 : i32
    %c0_i32_1 = arith.constant 0 : i32
    return %c0_i32, %c0_i32_0 : i32, i32
  }
  func.func @transform_4(%arg0: i32) -> (i32, i32, i32) {
    %c0_i32 = arith.constant 0 : i32
    %c0_i32_0 = arith.constant 0 : i32
    %c0_i32_1 = arith.constant 0 : i32
    %c0_i32_2 = arith.constant 0 : i32
    return %c0_i32, %c0_i32_0, %c0_i32_1 : i32, i32, i32
  }
  func.func @transform_5(%arg0: i32) -> (i32, i32, i32) {
    %c0_i32 = arith.constant 0 : i32
    %c0_i32_0 = arith.constant 0 : i32
    %c0_i32_1 = arith.constant 0 : i32
    %c0_i32_2 = arith.constant 0 : i32
    return %c0_i32, %c0_i32_0, %c0_i32_1 : i32, i32, i32
  }
  func.func @transform_6(%arg0: i32) -> (i32, i32) {
    %c0_i32 = arith.constant 0 : i32
    %c0_i32_0 = arith.constant 0 : i32
    %c0_i32_1 = arith.constant 0 : i32
    return %c0_i32, %c0_i32_0 : i32, i32
  }
  func.func @transform_7(%arg0: i32) -> (i32, i32) {
    %c0_i32 = arith.constant 0 : i32
    %c0_i32_0 = arith.constant 0 : i32
    %c0_i32_1 = arith.constant 0 : i32
    return %c0_i32, %c0_i32_0 : i32, i32
  }
  func.func @transform_8(%arg0: i32) -> (i32, i32, i32) {
    %c0_i32 = arith.constant 0 : i32
    %c0_i32_0 = arith.constant 0 : i32
    %c0_i32_1 = arith.constant 0 : i32
    return %arg0, %c0_i32, %c0_i32_0 : i32, i32, i32
  }
  func.func @transform_9(%arg0: i32) -> (i32, i32, i32) {
    %c0_i32 = arith.constant 0 : i32
    %c0_i32_0 = arith.constant 0 : i32
    %c0_i32_1 = arith.constant 0 : i32
    return %arg0, %c0_i32, %c0_i32_0 : i32, i32, i32
  }
}

</mosaic_0001>

<bundles_post_ra>
// kernel: feb_forward.1
= control target key start
LH: loop header
LB: loop body
LE: loop exit
PB: predicated region body
PF: predicated region fallthrough
CT: control target
= control target key end

     0   :  { %s2529_s30 = smov 0   ;;  %s3287_s0 = inlined_call_operand.vmem [shape: f32[2,8,256], index: 0, kind: input, shape index: {}]   ;;  %s3288_s1 = inlined_call_operand.vmem [shape: f32[2,256], index: 1, kind: input, shape index: {}]   ;;  %s3289_s2 = inlined_call_operand.vmem [shape: f32[8,72], index: 2, kind: input, shape index: {}]   ;;  %s3290_s3 = inlined_call_operand.vmem [shape: f32[8,1], index: 3, kind: input, shape index: {}]   ;;  %s3291_s4 = inlined_call_operand.vmem [shape: f32[6,8,72], index: 4, kind: input, shape index: {}]   ;;  %s3292_s5 = inlined_call_operand.vmem [shape: f32[6,8,1], index: 5, kind: input, shape index: {}]   ;;  %s3293_s6 = inlined_call_operand.vmem [shape: f32[16,72], index: 6, kind: input, shape index: {}]   ;;  %s3294_s7 = inlined_call_operand.vmem [shape: f32[16,1], index: 7, kind: input, shape index: {}]   ;;  %s3295_s8 = inlined_call_operand.vmem [shape: f32[2,16,256], index: 8, kind: output, shape index: {0}]   ;;  %s3296_s9 = inlined_call_operand.vmem [shape: f32[2,8,256], index: 9, kind: output, shape index: {1}]  }
   0x1 LB: > { %s2063_s10 = sadd.s32 4294967295, %s2461_s30   ;;  %p2067_p0 = scmp.ge.s32.totalorder %s2461_s30, 1  ;;  %s2461_s30 = sphi %s2529_s30, %s20_s30  }
   0x2   : > { %p290_p1 = scmp.lt.s32.totalorder %s2461_s30, 3 }
   0x4   : > { %p291_p2 = pnand %p2067_p0, %p290_p1 }
   0x5   : > { %p331_p3 = scmp.lt.s32.totalorder (!%p291_p2), %s2063_s10, 1  ;;  %s2463_s15 = smov (!%p291_p2), 34  }
   0x6   : > { %294 = sbr.rel (%p291_p2) target bundleno = 3335 (0xd07), region = 52  ;;  %s2464_s20 = smov (!%p291_p2), 32  }
   0x7   : > { %s2465_s21 = smov (!%p291_p2), 17   ;;  %s2466_s22 = smov (!%p291_p2), 18  }
   0x8   : > { %s2467_s23 = smov (!%p291_p2), 16   ;;  %s2468_s24 = smov (!%p291_p2), 2  }
   0x9   : > { %s2470_s25 = smov (!%p291_p2), 95   ;;  %s2471_s26 = smov (!%p291_p2), 94  }
   0xa   : > { %s2472_s27 = smov (!%p291_p2), 111   ;;  %s2473_s28 = smov (!%p291_p2), 110  }
   0xb   : > { %v2074_v0 = vld [vmem:[%s3288_s1 + $0x1] ss:$2 sm:$0x3]  ;;  %s3298_s10 = smov (!%p331_p3, %s2063_s10), 1  ;;  %vm349_vm0 = vcmask 138240   ;;  %v2469_v8 = vmov 0.0  }
   0xc   : > { %v385_v1 = vperm.slane %v2074_v0, 0  ;;  %v346_v2 = vld [vmem:[%s3288_s1] ss:$2 sm:$0x3]  ;;  %s2105_s16 = sshll.u32 %s3298_s10, 4  ;;  %v386_v5 = vperm.slane %v2074_v0, 1 }
   0xd   : > { %v2545_v3 = vperm.slane %v346_v2, 0  ;;  %s335_s19 = scalar_lea.vmem %s3287_s0, %s2105_s16  ;;  %v2555_v6 = vperm.slane %v346_v2, 1  ;;  %350 = vst.msk [vmem:[#allocation2] sm:$0xff] %vm349_vm0, %v2469_v8  ;;  %vm351_vm1 = vcmask 1047688   ;;  %vm439_vm2 = vcmask 277504   ;;  %s2474_s29 = smov 96  }
   0xe   : > { %435 = vrot.lane.b32.xlu1 %v385_v1, %s2463_s15  ;;  %v355_v4 = vld [vmem:[%s335_s19] sm:$0xff]  ;;  %v356_v7 = vld [vmem:[%s335_s19 + $0x8] sm:$0xff]  ;;  %352 = vst.msk [vmem:[#allocation2 + $0x10] sm:$0xff] %vm351_vm1, %v2469_v8  ;;  %vm427_vm3 = vcmask 261120   ;;  %vm415_vm4 = vcmask 146432   ;;  %vm403_vm5 = vcmask 130048   ;;  %s345_s18 = scalar_lea.vmem %s3296_s9, %s2105_s16 }
   0xf   : > { %423 = vrot.lane.b32.xlu2 %v2545_v3, %s2464_s20  ;;  %359 = vrot.lane.b32.xlu0 %v355_v4, %s2465_s21  ;;  %353 = vst.msk [vmem:[#allocation3] sm:$0xff] %vm349_vm0, %v2469_v8  ;;  %s2475_s11 = smov 112   ;;  %vm391_vm6 = vcmask 15360   ;;  %s2476_s12 = smov 127   ;;  %v371_v57 = vld [vmem:[%s3290_s3] sm:$0xff]  ;;  %v2478_v58 = vmov 0  }
  0x10   : > { %354 = vst.msk [vmem:[#allocation3 + $0x10] sm:$0xff] %vm351_vm1, %v2469_v8  ;;  %s2477_s13 = smov 126   ;;  %2172 = vset.pattern.permute.xlu1 %v2478_v58  ;;  %2213 = vset.pattern.permute.xlu2 %v2478_v58  ;;  %vm548_vm7 = vcmask 769024   ;;  %vm534_vm8 = vcmask 777216   ;;  %vm523_vm9 = vcmask 785408   ;;  %vm509_vm10 = vcmask 900096  }
  0x11   : > { %2254 = vset.pattern.permute.xlu0 %v2478_v58  ;;  %vm495_vm11 = vcmask 908288   ;;  %vm484_vm12 = vcmask 916480   ;;  %vm470_vm13 = vcmask 1031168   ;;  %vm456_vm14 = vcmask 1039360  }
  0x12   : > { %vm558_vm15 = vcmask 588800  }
  0x16   : > { %437 = vrot.lane.b32.xlu1 %v386_v5, %s2463_s15 }
  0x17   : > { %425 = vrot.lane.b32.xlu2 %v2555_v6, %s2464_s20  ;;  %361 = vrot.lane.b32.xlu0 %v356_v7, %s2465_s21 }
  0x1e   : > { %413 = vrot.lane.b32.xlu1 %v386_v5, %s2466_s22 }
  0x1f   : > { %399 = vrot.lane.b32.xlu2 %v2545_v3, %s2467_s23  ;;  %411 = vrot.lane.b32.xlu0 %v385_v1, %s2466_s22 }
  0x26   : > { %387 = vrot.lane.b32.xlu1 %v385_v1, %s2468_s24 }
  0x27   : > { %389 = vrot.lane.b32.xlu2 %v386_v5, %s2468_s24  ;;  %401 = vrot.lane.b32.xlu0 %v2555_v6, %s2467_s23 }
  0x69   : > { %v2570_v13 = vpop.permute.xlu2 %423 }
  0x71   : > { %v2583_v19 = vpop.permute.xlu2 %425 }
  0x72   : > { %v2599_v24 = vsel %vm427_vm3, %v2570_v13, %v2583_v19 }
  0x79   : > { %v2608_v28 = vpop.permute.xlu2 %399 }
  0x80   : > { %v2566_v10 = vpop.permute.xlu1 %435 }
  0x81   : > { %v360_v9 = vpop.permute.xlu0 %359  ;;  %v2636_v41 = vpop.permute.xlu2 %389 }
  0x82   : > { %367 = vst.msk [vmem:[#allocation2] sm:$0xff] %vm351_vm1, %v360_v9 }
  0x88   : > { %v2579_v16 = vpop.permute.xlu1 %437 }
  0x89   : > { %v362_v11 = vpop.permute.xlu0 %361  ;;  %v2568_v12 = vld [vmem:[#allocation2] sm:$0xff]  ;;  %v2593_v22 = vsel %vm439_vm2, %v2566_v10, %v2579_v16 }
  0x8a   : > { %v2573_v14 = vsel %vm349_vm0, %v360_v9, %v362_v11  ;;  %369 = vst.msk [vmem:[#allocation2 + $0x10] sm:$0xff] %vm349_vm0, %v362_v11  ;;  %v444_v26 = vmul.f32 %v2566_v10, %v2568_v12  ;;  %v432_v29 = vmul.f32 %v2570_v13, %v2568_v12  ;;  %v408_v43 = vmul.f32 %v2608_v28, %v2568_v12 }
  0x8b   : > { %v2132_v15 = vpack.i.bf16 %v2573_v14, %v2568_v12  ;;  %v445_v27 = vmul.f32 %v2593_v22, %v2573_v14  ;;  %v433_v30 = vmul.f32 %v2599_v24, %v2573_v14 }
  0x8d   : > { %2133 = vrot.lane.b32.xlu2 %v2132_v15, %s2470_s25  ;;  %v2142_v32 = vpack.i.bf16 %v445_v27, %v444_v26  ;;  %v2147_v34 = vpack.i.bf16 %v433_v30, %v432_v29 }
  0x90   : > { %v2589_v21 = vpop.permute.xlu1 %413 }
  0x91   : > { %v383_v17 = vld [vmem:[#allocation2 + $0x10] sm:$0xff]  ;;  %v2587_v20 = vpop.permute.xlu0 %411 }
  0x92   : > { %532 = vrot.lane.b32.xlu0 %v383_v17, %s2470_s25  ;;  %v446_v18 = vmul.f32 %v2579_v16, %v383_v17  ;;  %v422_v23 = vmul.f32 %v2589_v21, %v383_v17  ;;  %v434_v25 = vmul.f32 %v2583_v19, %v383_v17  ;;  %v2618_v33 = vsel %vm415_vm4, %v2587_v20, %v2589_v21 }
  0x93   : > { %v420_v37 = vmul.f32 %v2587_v20, %v2568_v12  ;;  %v421_v38 = vmul.f32 %v2618_v33, %v2573_v14  ;;  %v398_v49 = vmul.f32 %v2636_v41, %v383_v17 }
  0x94   : > { %546 = vrot.lane.b32.xlu1 %v446_v18, %s2471_s26 }
  0x95   : > { %2138 = vrot.lane.b32.xlu2 %v2132_v15, %s2472_s27  ;;  %v2152_v42 = vpack.i.bf16 %v421_v38, %v420_v37 }
  0x98   : > { %v2632_v39 = vpop.permute.xlu1 %387 }
  0x99   : > { %v2614_v31 = vpop.permute.xlu0 %401  ;;  %v2642_v44 = vsel %vm391_vm6, %v2632_v39, %v2636_v41  ;;  %v396_v46 = vmul.f32 %v2632_v39, %v2568_v12 }
  0x9a   : > { %493 = vrot.lane.b32.xlu0 %v383_v17, %s2472_s27  ;;  %v2623_v35 = vsel %vm403_vm5, %v2608_v28, %v2614_v31  ;;  %v410_v36 = vmul.f32 %v2614_v31, %v383_v17  ;;  %v397_v47 = vmul.f32 %v2642_v44, %v2573_v14 }
  0x9b   : > { %v409_v40 = vmul.f32 %v2623_v35, %v2573_v14 }
  0x9c   : > { %507 = vrot.lane.b32.xlu1 %v422_v23, %s2473_s28  ;;  %v2167_v48 = vpack.i.bf16 %v397_v47, %v396_v46 }
  0x9d   : > { %521 = vrot.lane.b32.xlu2 %v434_v25, %s2474_s29  ;;  %v2157_v45 = vpack.i.bf16 %v409_v40, %v408_v43 }
  0xa2   : > { %2143 = vrot.lane.b32.xlu0 %v2142_v32, %s2471_s26 }
  0xa4   : > { %2148 = vrot.lane.b32.xlu1 %v2147_v34, %s2474_s29 }
  0xa5   : > { %482 = vrot.lane.b32.xlu2 %v410_v36, %s2475_s11 }
  0xaa   : > { %2153 = vrot.lane.b32.xlu0 %v2152_v42, %s2473_s28 }
  0xac   : > { %2158 = vrot.lane.b32.xlu1 %v2157_v45, %s2475_s11 }
  0xad   : > { %2163 = vrot.lane.b32.xlu2 %v2132_v15, %s2476_s12 }
  0xb2   : > { %2168 = vrot.lane.b32.xlu0 %v2167_v48, %s2477_s13 }
  0xb4   : > { %468 = vrot.lane.b32.xlu1 %v398_v49, %s2477_s13 }
  0xba   : > { %454 = vrot.lane.b32.xlu0 %v383_v17, %s2476_s12 }
  0xbc   : > { %555 = vperm.xlu1 %2172, %v371_v57   ;;  %v380_v57 = vmul.f32 %v2555_v6, %v2573_v14 }
  0xe7   : > { %v2134_v50 = vpop.permute.xlu2 %2133 }
  0xe8   : > { %v2136_v60 = vunpack.i.h.bf16 %v2134_v50  ;;  %v2135_v61 = vunpack.i.l.bf16 %v2134_v50 }
  0xea   : > { %v535_v8 = vsel %vm534_vm8, %v2135_v61, %v2136_v60 }
  0xef   : > { %v2139_v51 = vpop.permute.xlu2 %2138 }
  0xf0   : > { %v2141_v18 = vunpack.i.h.bf16 %v2139_v51  ;;  %v2140_v23 = vunpack.i.l.bf16 %v2139_v51 }
  0xf2   : > { %v496_v36 = vsel %vm495_vm11, %v2140_v23, %v2141_v18 }
  0xf7   : > { %v522_v55 = vpop.permute.xlu2 %521 }
  0xff   : > { %v483_v7 = vpop.permute.xlu2 %482 }
 0x104   : > { %v533_v52 = vpop.permute.xlu0 %532 }
 0x105   : > { %v536_v9 = vsel %vm534_vm8, %v2136_v60, %v533_v52 }
 0x106   : > { %v547_v53 = vpop.permute.xlu1 %546 }
 0x107   : > { %v2164_v38 = vpop.permute.xlu2 %2163 }
 0x108   : > { %v2166_v45 = vunpack.i.h.bf16 %v2164_v38  ;;  %v2165_v46 = vunpack.i.l.bf16 %v2164_v38 }
 0x10a   : > { %v457_v52 = vsel %vm456_vm14, %v2165_v46, %v2166_v45 }
 0x10c   : > { %v494_v54 = vpop.permute.xlu0 %493 }
 0x10d   : > { %v497_v37 = vsel %vm495_vm11, %v2141_v18, %v494_v54  ;;  %v370_v54 = vld [vmem:[%s3289_s2] sm:$0xff] }
 0x10e   : > { %v508_v56 = vpop.permute.xlu1 %507 }
 0x114   : > { %v2144_v59 = vpop.permute.xlu0 %2143 }
 0x115   : > { %v2146_v62 = vunpack.i.h.bf16 %v2144_v59  ;;  %v2145_v63 = vunpack.i.l.bf16 %v2144_v59 }
 0x116   : > { %v2149_v0 = vpop.permute.xlu1 %2148 }
 0x117   : > { %v2151_v1 = vunpack.i.h.bf16 %v2149_v0  ;;  %v2150_v2 = vunpack.i.l.bf16 %v2149_v0  ;;  %v549_v4 = vsel %vm548_vm7, %v2145_v63, %v2146_v62  ;;  %v550_v5 = vsel %vm548_vm7, %v2146_v62, %v547_v53 }
 0x118   : > { %569 = vmatpush.msra.mxu0 %v549_v4  ;;  %589 = vmatpush.msra.mxu1 %v550_v5  ;;  %v379_v53 = vmul.f32 %v2568_v12, %v2545_v3 }
 0x119   : > { %v524_v11 = vsel %vm523_vm9, %v2150_v2, %v2151_v1  ;;  %v525_v15 = vsel %vm523_vm9, %v2151_v1, %v522_v55 }
 0x11a   : > { %570 = vmatpush.msra.mxu0 %v535_v8  ;;  %590 = vmatpush.msra.mxu1 %v536_v9 }
 0x11c   : > { %v2154_v17 = vpop.permute.xlu0 %2153  ;;  %571 = vmatpush.msra.mxu0 %v524_v11  ;;  %591 = vmatpush.msra.mxu1 %v525_v15 }
 0x11d   : > { %v2156_v25 = vunpack.i.h.bf16 %v2154_v17  ;;  %v2155_v26 = vunpack.i.l.bf16 %v2154_v17 }
 0x11e   : > { %v2159_v27 = vpop.permute.xlu1 %2158 }
 0x11f   : > { %v2161_v29 = vunpack.i.h.bf16 %v2159_v27  ;;  %v2160_v30 = vunpack.i.l.bf16 %v2159_v27  ;;  %v510_v32 = vsel %vm509_vm10, %v2155_v26, %v2156_v25  ;;  %v511_v34 = vsel %vm509_vm10, %v2156_v25, %v508_v56 }
 0x120   : > { %572 = vmatpush.msra.mxu0 %v510_v32  ;;  %592 = vmatpush.msra.mxu1 %v511_v34 }
 0x121   : > { %v485_v40 = vsel %vm484_vm12, %v2160_v30, %v2161_v29  ;;  %v486_v42 = vsel %vm484_vm12, %v2161_v29, %v483_v7 }
 0x122   : > { %573 = vmatpush.msra.mxu0 %v496_v36  ;;  %593 = vmatpush.msra.mxu1 %v497_v37 }
 0x124   : > { %v2169_v43 = vpop.permute.xlu0 %2168  ;;  %574 = vmatpush.msra.mxu0 %v485_v40  ;;  %594 = vmatpush.msra.mxu1 %v486_v42 }
 0x125   : > { %v2171_v47 = vunpack.i.h.bf16 %v2169_v43  ;;  %v2170_v48 = vunpack.i.l.bf16 %v2169_v43 }
 0x126   : > { %v469_v49 = vpop.permute.xlu1 %468 }
 0x127   : > { %v471_v50 = vsel %vm470_vm13, %v2170_v48, %v2171_v47  ;;  %v472_v51 = vsel %vm470_vm13, %v2171_v47, %v469_v49 }
 0x128   : > { %575 = vmatpush.msra.mxu0 %v471_v50  ;;  %595 = vmatpush.msra.mxu1 %v472_v51 }
 0x12a   : > { %576 = vmatpush.msra.mxu0 %v457_v52 }
 0x12c   : > { %v455_v55 = vpop.permute.xlu0 %454  ;;  %577 = vmatpush.msra.mxu0 %v379_v53  ;;  %v622_v53 = vld [vmem:[%s3292_s5] sm:$0xff] }
 0x12d   : > { %2075 = vmatmul.msk.f32.vlgmr.msra.gmra.mxu0 %vm558_vm15, %v370_v54  ;;  %v458_v56 = vsel %vm456_vm14, %v2166_v45, %v455_v55 }
 0x12e   : > { %596 = vmatpush.msra.mxu1 %v458_v56  ;;  %v556_v58 = vpop.permute.xlu1 %555 }
 0x130   : > { %597 = vmatpush.msra.mxu1 %v380_v57 }
 0x131   : > { %2076 = vmatmul.msk.f32.vlgmr.msra.gmra.mxu1 %vm558_vm15, %v370_v54 }
 0x1aa   : > { %v579_v12 = vpop.f32.mrf.mxu0 }
 0x1ab   : > { %v580_v59 = vadd.f32 %v579_v12, %v556_v58 }
 0x1ad   : > { %v604_v60 = vmul.f32 0.2, %v580_v59  ;;  %vm602_vm2 = vcmp.gt.f32.partialorder %v580_v59, 0.0 }
 0x1ae   : > { %v599_v61 = vpop.f32.mrf.mxu1 }
 0x1af   : > { %v600_v62 = vadd.f32 %v599_v61, %v556_v58  ;;  %v2683_v63 = vsel %vm602_vm2, %v580_v59, %v604_v60 }
 0x1b0   : > { %610 = vrot.lane.b32.xlu2 %v2683_v63, %s2465_s21 }
 0x1b1   : > { %v605_v0 = vmul.f32 0.2, %v600_v62  ;;  %vm603_vm3 = vcmp.gt.f32.partialorder %v600_v62, 0.0 }
 0x1b3   : > { %v2687_v1 = vsel %vm603_vm3, %v600_v62, %v605_v0 }
 0x1b4   : > { %612 = vrot.lane.b32.xlu0 %v2687_v1, %s2465_s21 }
 0x20a   : > { %v611_v14 = vpop.permute.xlu2 %610 }
 0x20b   : > { %618 = vst.msk [vmem:[#allocation3] sm:$0xff] %vm351_vm1, %v611_v14 }
 0x212   : > { %v2696_v5 = vld [vmem:[#allocation3] sm:$0xff] }
 0x213   : > { %v642_v18 = vmul.f32 %v2696_v5, %v2566_v10  ;;  %v639_v26 = vmul.f32 %v2696_v5, %v2570_v13  ;;  %v636_v32 = vmul.f32 %v2696_v5, %v2587_v20  ;;  %v633_v37 = vmul.f32 %v2696_v5, %v2608_v28 }
 0x214   : > { %v630_v42 = vmul.f32 %v2696_v5, %v2632_v39 }
 0x226   : > { %v613_v2 = vpop.permute.xlu0 %612 }
 0x227   : > { %v2693_v4 = vsel %vm349_vm0, %v611_v14, %v613_v2  ;;  %620 = vst.msk [vmem:[#allocation3 + $0x10] sm:$0xff] %vm349_vm0, %v613_v2 }
 0x228   : > { %v2173_v7 = vpack.i.bf16 %v2693_v4, %v2696_v5  ;;  %v643_v17 = vmul.f32 %v2693_v4, %v2593_v22  ;;  %v640_v23 = vmul.f32 %v2693_v4, %v2599_v24  ;;  %v637_v30 = vmul.f32 %v2693_v4, %v2618_v33 }
 0x229   : > { %v634_v34 = vmul.f32 %v2693_v4, %v2623_v35  ;;  %v631_v40 = vmul.f32 %v2693_v4, %v2642_v44 }
 0x22a   : > { %2174 = vrot.lane.b32.xlu0 %v2173_v7, %s2470_s25  ;;  %v2183_v25 = vpack.i.bf16 %v643_v17, %v642_v18  ;;  %v2188_v27 = vpack.i.bf16 %v640_v23, %v639_v26  ;;  %v2193_v36 = vpack.i.bf16 %v637_v30, %v636_v32 }
 0x22b   : > { %v2198_v38 = vpack.i.bf16 %v634_v34, %v633_v37  ;;  %v2208_v43 = vpack.i.bf16 %v631_v40, %v630_v42 }
 0x22e   : > { %v629_v8 = vld [vmem:[#allocation3 + $0x10] sm:$0xff] }
 0x22f   : > { %724 = vrot.lane.b32.xlu1 %v629_v8, %s2470_s25  ;;  %v644_v9 = vmul.f32 %v629_v8, %v2579_v16  ;;  %v638_v11 = vmul.f32 %v629_v8, %v2589_v21  ;;  %v641_v15 = vmul.f32 %v629_v8, %v2583_v19  ;;  %v635_v29 = vmul.f32 %v629_v8, %v2614_v31 }
 0x230   : > { %v632_v45 = vmul.f32 %v629_v8, %v2636_v41 }
 0x231   : > { %737 = vrot.lane.b32.xlu2 %v644_v9, %s2471_s26 }
 0x232   : > { %2179 = vrot.lane.b32.xlu0 %v2173_v7, %s2472_s27 }
 0x237   : > { %688 = vrot.lane.b32.xlu1 %v629_v8, %s2472_s27 }
 0x239   : > { %701 = vrot.lane.b32.xlu2 %v638_v11, %s2473_s28 }
 0x23a   : > { %714 = vrot.lane.b32.xlu0 %v641_v15, %s2474_s29 }
 0x23f   : > { %2184 = vrot.lane.b32.xlu1 %v2183_v25, %s2471_s26 }
 0x241   : > { %2189 = vrot.lane.b32.xlu2 %v2188_v27, %s2474_s29 }
 0x242   : > { %678 = vrot.lane.b32.xlu0 %v635_v29, %s2475_s11 }
 0x247   : > { %2194 = vrot.lane.b32.xlu1 %v2193_v36, %s2473_s28 }
 0x249   : > { %2199 = vrot.lane.b32.xlu2 %v2198_v38, %s2475_s11 }
 0x24a   : > { %2204 = vrot.lane.b32.xlu0 %v2173_v7, %s2476_s12 }
 0x24f   : > { %2209 = vrot.lane.b32.xlu1 %v2208_v43, %s2477_s13 }
 0x251   : > { %665 = vrot.lane.b32.xlu2 %v632_v45, %s2477_s13 }
 0x257   : > { %652 = vrot.lane.b32.xlu1 %v629_v8, %s2476_s12 }
 0x259   : > { %745 = vperm.xlu2 %2213, %v622_v53  }
 0x28b   : > { %v738_v46 = vpop.permute.xlu2 %737 }
 0x293   : > { %v702_v50 = vpop.permute.xlu2 %701 }
 0x29b   : > { %v2190_v54 = vpop.permute.xlu2 %2189 }
 0x29c   : > { %v2175_v47 = vpop.permute.xlu0 %2174  ;;  %v2192_v59 = vunpack.i.h.bf16 %v2190_v54  ;;  %v2191_v60 = vunpack.i.l.bf16 %v2190_v54  ;;  %v626_v54 = vmul.f32 %v2693_v4, %v2555_v6 }
 0x29d   : > { %v2177_v56 = vunpack.i.h.bf16 %v2175_v47  ;;  %v2176_v57 = vunpack.i.l.bf16 %v2175_v47 }
 0x29e   : > { %v716_v7 = vsel %vm523_vm9, %v2191_v60, %v2192_v59 }
 0x29f   : > { %v726_v14 = vsel %vm534_vm8, %v2176_v57, %v2177_v56 }
 0x2a1   : > { %v725_v48 = vpop.permute.xlu1 %724 }
 0x2a2   : > { %v727_v2 = vsel %vm534_vm8, %v2177_v56, %v725_v48 }
 0x2a3   : > { %v2200_v9 = vpop.permute.xlu2 %2199 }
 0x2a4   : > { %v2180_v49 = vpop.permute.xlu0 %2179  ;;  %v2202_v25 = vunpack.i.h.bf16 %v2200_v9  ;;  %v2201_v26 = vunpack.i.l.bf16 %v2200_v9 }
 0x2a5   : > { %v2182_v15 = vunpack.i.h.bf16 %v2180_v49  ;;  %v2181_v17 = vunpack.i.l.bf16 %v2180_v49 }
 0x2a6   : > { %v680_v36 = vsel %vm484_vm12, %v2201_v26, %v2202_v25 }
 0x2a7   : > { %v690_v30 = vsel %vm495_vm11, %v2181_v17, %v2182_v15 }
 0x2a9   : > { %v689_v51 = vpop.permute.xlu1 %688 }
 0x2aa   : > { %v691_v32 = vsel %vm495_vm11, %v2182_v15, %v689_v51  ;;  %v621_v51 = vld [vmem:[%s3291_s4] sm:$0xff] }
 0x2ac   : > { %v715_v52 = vpop.permute.xlu0 %714 }
 0x2ad   : > { %v717_v8 = vsel %vm523_vm9, %v2192_v59, %v715_v52 }
 0x2b1   : > { %v2185_v55 = vpop.permute.xlu1 %2184 }
 0x2b2   : > { %v2187_v58 = vunpack.i.h.bf16 %v2185_v55  ;;  %v2186_v12 = vunpack.i.l.bf16 %v2185_v55 }
 0x2b4   : > { %v739_v61 = vsel %vm548_vm7, %v2186_v12, %v2187_v58  ;;  %v740_v62 = vsel %vm548_vm7, %v2187_v58, %v738_v46  ;;  %v679_v0 = vpop.permute.xlu0 %678  ;;  %v666_v46 = vpop.permute.xlu2 %665 }
 0x2b5   : > { %758 = vmatpush.msra.mxu2 %v739_v61  ;;  %778 = vmatpush.msra.mxu3 %v740_v62  ;;  %v681_v37 = vsel %vm484_vm12, %v2202_v25, %v679_v0 }
 0x2b7   : > { %759 = vmatpush.msra.mxu2 %v726_v14  ;;  %779 = vmatpush.msra.mxu3 %v727_v2 }
 0x2b9   : > { %v2195_v11 = vpop.permute.xlu1 %2194  ;;  %760 = vmatpush.msra.mxu2 %v716_v7  ;;  %780 = vmatpush.msra.mxu3 %v717_v8 }
 0x2ba   : > { %v2197_v18 = vunpack.i.h.bf16 %v2195_v11  ;;  %v2196_v23 = vunpack.i.l.bf16 %v2195_v11 }
 0x2bc   : > { %v703_v27 = vsel %vm509_vm10, %v2196_v23, %v2197_v18  ;;  %v704_v29 = vsel %vm509_vm10, %v2197_v18, %v702_v50  ;;  %v2205_v34 = vpop.permute.xlu0 %2204  ;;  %v625_v50 = vmul.f32 %v2696_v5, %v2545_v3  ;;  %v746_v55 = vpop.permute.xlu2 %745 }
 0x2bd   : > { %761 = vmatpush.msra.mxu2 %v703_v27  ;;  %781 = vmatpush.msra.mxu3 %v704_v29  ;;  %v2207_v43 = vunpack.i.h.bf16 %v2205_v34  ;;  %v2206_v45 = vunpack.i.l.bf16 %v2205_v34 }
 0x2bf   : > { %762 = vmatpush.msra.mxu2 %v690_v30  ;;  %782 = vmatpush.msra.mxu3 %v691_v32  ;;  %v654_v49 = vsel %vm456_vm14, %v2206_v45, %v2207_v43 }
 0x2c1   : > { %v2210_v38 = vpop.permute.xlu1 %2209  ;;  %763 = vmatpush.msra.mxu2 %v680_v36  ;;  %783 = vmatpush.msra.mxu3 %v681_v37 }
 0x2c2   : > { %v2212_v40 = vunpack.i.h.bf16 %v2210_v38  ;;  %v2211_v42 = vunpack.i.l.bf16 %v2210_v38 }
 0x2c4   : > { %v667_v47 = vsel %vm470_vm13, %v2211_v42, %v2212_v40  ;;  %v668_v48 = vsel %vm470_vm13, %v2212_v40, %v666_v46 }
 0x2c5   : > { %764 = vmatpush.msra.mxu2 %v667_v47  ;;  %784 = vmatpush.msra.mxu3 %v668_v48 }
 0x2c7   : > { %765 = vmatpush.msra.mxu2 %v654_v49 }
 0x2c9   : > { %v653_v52 = vpop.permute.xlu1 %652  ;;  %766 = vmatpush.msra.mxu2 %v625_v50 }
 0x2ca   : > { %2077 = vmatmul.msk.f32.vlgmr.msra.gmra.mxu2 %vm558_vm15, %v621_v51  ;;  %v655_v53 = vsel %vm456_vm14, %v2207_v43, %v653_v52 }
 0x2cb   : > { %785 = vmatpush.msra.mxu3 %v655_v53 }
 0x2cd   : > { %786 = vmatpush.msra.mxu3 %v626_v54 }
 0x2ce   : > { %2078 = vmatmul.msk.f32.vlgmr.msra.gmra.mxu3 %vm558_vm15, %v621_v51 }
 0x34d   : > { %v768_v56 = vpop.f32.mrf.mxu2 }
 0x34e   : > { %v769_v5 = vadd.f32 %v768_v56, %v746_v55 }
 0x350   : > { %v793_v57 = vmul.f32 0.2, %v769_v5  ;;  %vm791_vm4 = vcmp.gt.f32.partialorder %v769_v5, 0.0 }
 0x351   : > { %v788_v58 = vpop.f32.mrf.mxu3 }
 0x352   : > { %v789_v12 = vadd.f32 %v788_v58, %v746_v55  ;;  %v795_v59 = vsel %vm791_vm4, %v769_v5, %v793_v57  ;;  %v2080_v58 = vld [vmem:[%s3292_s5 + $0x8] sm:$0xff] }
 0x353   : > { %799 = vrot.lane.b32.xlu0 %v795_v59, %s2465_s21 }
 0x354   : > { %v794_v60 = vmul.f32 0.2, %v789_v12  ;;  %vm792_vm5 = vcmp.gt.f32.partialorder %v789_v12, 0.0 }
 0x356   : > { %v796_v61 = vsel %vm792_vm5, %v789_v12, %v794_v60 }
 0x357   : > { %801 = vrot.lane.b32.xlu1 %v796_v61, %s2465_s21 }
 0x3c5   : > { %v800_v62 = vpop.permute.xlu0 %799 }
 0x3c6   : > { %807 = vst.msk [vmem:[#allocation3] sm:$0xff] %vm351_vm1, %v800_v62 }
 0x3c9   : > { %v802_v4 = vpop.permute.xlu1 %801 }
 0x3ca   : > { %809 = vst.msk [vmem:[#allocation3 + $0x10] sm:$0xff] %vm349_vm0, %v802_v4  ;;  %v2774_v0 = vsel %vm349_vm0, %v800_v62, %v802_v4 }
 0x3cb   : > { %v834_v15 = vmul.f32 %v2774_v0, %v2593_v22  ;;  %v831_v25 = vmul.f32 %v2774_v0, %v2599_v24  ;;  %v828_v29 = vmul.f32 %v2774_v0, %v2618_v33  ;;  %v825_v36 = vmul.f32 %v2774_v0, %v2623_v35 }
 0x3cc   : > { %v822_v40 = vmul.f32 %v2774_v0, %v2642_v44 }
 0x3cd   : > { %v2776_v14 = vld [vmem:[#allocation3] sm:$0xff] }
 0x3ce   : > { %v2214_v2 = vpack.i.bf16 %v2774_v0, %v2776_v14  ;;  %v833_v11 = vmul.f32 %v2776_v14, %v2566_v10  ;;  %v830_v17 = vmul.f32 %v2776_v14, %v2570_v13  ;;  %v827_v27 = vmul.f32 %v2776_v14, %v2587_v20 }
 0x3cf   : > { %v824_v30 = vmul.f32 %v2776_v14, %v2608_v28  ;;  %v821_v38 = vmul.f32 %v2776_v14, %v2632_v39 }
 0x3d0   : > { %2215 = vrot.lane.b32.xlu1 %v2214_v2, %s2470_s25  ;;  %v2224_v23 = vpack.i.bf16 %v834_v15, %v833_v11  ;;  %v2229_v26 = vpack.i.bf16 %v831_v25, %v830_v17  ;;  %v2234_v34 = vpack.i.bf16 %v828_v29, %v827_v27 }
 0x3d1   : > { %v820_v7 = vld [vmem:[#allocation3 + $0x10] sm:$0xff]  ;;  %v2239_v37 = vpack.i.bf16 %v825_v36, %v824_v30  ;;  %v2249_v42 = vpack.i.bf16 %v822_v40, %v821_v38 }
 0x3d2   : > { %915 = vrot.lane.b32.xlu2 %v820_v7, %s2470_s25  ;;  %v835_v8 = vmul.f32 %v820_v7, %v2579_v16  ;;  %v829_v9 = vmul.f32 %v820_v7, %v2589_v21  ;;  %v832_v18 = vmul.f32 %v820_v7, %v2583_v19  ;;  %v826_v32 = vmul.f32 %v820_v7, %v2614_v31 }
 0x3d3   : > { %v823_v43 = vmul.f32 %v820_v7, %v2636_v41 }
 0x3d4   : > { %928 = vrot.lane.b32.xlu0 %v835_v8, %s2471_s26 }
 0x3d8   : > { %2220 = vrot.lane.b32.xlu1 %v2214_v2, %s2472_s27 }
 0x3da   : > { %879 = vrot.lane.b32.xlu2 %v820_v7, %s2472_s27 }
 0x3dc   : > { %892 = vrot.lane.b32.xlu0 %v829_v9, %s2473_s28 }
 0x3e0   : > { %905 = vrot.lane.b32.xlu1 %v832_v18, %s2474_s29 }
 0x3e2   : > { %2225 = vrot.lane.b32.xlu2 %v2224_v23, %s2471_s26 }
 0x3e4   : > { %2230 = vrot.lane.b32.xlu0 %v2229_v26, %s2474_s29 }
 0x3e8   : > { %869 = vrot.lane.b32.xlu1 %v826_v32, %s2475_s11 }
 0x3ea   : > { %2235 = vrot.lane.b32.xlu2 %v2234_v34, %s2473_s28 }
 0x3ec   : > { %2240 = vrot.lane.b32.xlu0 %v2239_v37, %s2475_s11 }
 0x3f0   : > { %2245 = vrot.lane.b32.xlu1 %v2214_v2, %s2476_s12 }
 0x3f2   : > { %2250 = vrot.lane.b32.xlu2 %v2249_v42, %s2477_s13 }
 0x3f4   : > { %856 = vrot.lane.b32.xlu0 %v823_v43, %s2477_s13 }
 0x3fa   : > { %843 = vrot.lane.b32.xlu2 %v820_v7, %s2476_s12 }
 0x3fc   : > { %936 = vperm.xlu0 %2254, %v2080_v58  }
 0x42c   : > { %v916_v45 = vpop.permute.xlu2 %915 }
 0x434   : > { %v880_v46 = vpop.permute.xlu2 %879 }
 0x43c   : > { %v2226_v47 = vpop.permute.xlu2 %2225 }
 0x43d   : > { %v2228_v48 = vunpack.i.h.bf16 %v2226_v47  ;;  %v2227_v49 = vunpack.i.l.bf16 %v2226_v47 }
 0x43f   : > { %v930_v50 = vsel %vm548_vm7, %v2227_v49, %v2228_v48  ;;  %v2079_v49 = vld [vmem:[%s3291_s4 + $0x8] sm:$0xff] }
 0x440   : > { %949 = vmatpush.msrb.mxu0 %v930_v50 }
 0x442   : > { %v2216_v51 = vpop.permute.xlu1 %2215 }
 0x443   : > { %v2218_v52 = vunpack.i.h.bf16 %v2216_v51  ;;  %v2217_v53 = vunpack.i.l.bf16 %v2216_v51 }
 0x444   : > { %v2236_v59 = vpop.permute.xlu2 %2235 }
 0x445   : > { %v917_v54 = vsel %vm534_vm8, %v2217_v53, %v2218_v52  ;;  %v918_v5 = vsel %vm534_vm8, %v2218_v52, %v916_v45  ;;  %v2238_v62 = vunpack.i.h.bf16 %v2236_v59  ;;  %v2237_v4 = vunpack.i.l.bf16 %v2236_v59 }
 0x446   : > { %v929_v55 = vpop.permute.xlu0 %928  ;;  %950 = vmatpush.msrb.mxu0 %v917_v54  ;;  %v817_v53 = vmul.f32 %v2774_v0, %v2555_v6 }
 0x447   : > { %v931_v56 = vsel %vm548_vm7, %v2228_v48, %v929_v55  ;;  %v894_v18 = vsel %vm509_vm10, %v2237_v4, %v2238_v62  ;;  %v816_v48 = vmul.f32 %v2776_v14, %v2545_v3 }
 0x448   : > { %969 = vmatpush.msrb.mxu1 %v931_v56 }
 0x44a   : > { %970 = vmatpush.msrb.mxu1 %v918_v5  ;;  %v2221_v57 = vpop.permute.xlu1 %2220 }
 0x44b   : > { %v2223_v8 = vunpack.i.h.bf16 %v2221_v57  ;;  %v2222_v9 = vunpack.i.l.bf16 %v2221_v57 }
 0x44c   : > { %v2251_v25 = vpop.permute.xlu2 %2250 }
 0x44d   : > { %v881_v26 = vsel %vm495_vm11, %v2222_v9, %v2223_v8  ;;  %v882_v27 = vsel %vm495_vm11, %v2223_v8, %v880_v46  ;;  %v2253_v30 = vunpack.i.h.bf16 %v2251_v25  ;;  %v2252_v32 = vunpack.i.l.bf16 %v2251_v25 }
 0x44e   : > { %v893_v12 = vpop.permute.xlu0 %892 }
 0x44f   : > { %v895_v23 = vsel %vm509_vm10, %v2238_v62, %v893_v12  ;;  %v858_v42 = vsel %vm470_vm13, %v2252_v32, %v2253_v30 }
 0x452   : > { %v906_v60 = vpop.permute.xlu1 %905 }
 0x454   : > { %v844_v51 = vpop.permute.xlu2 %843 }
 0x456   : > { %v2231_v61 = vpop.permute.xlu0 %2230 }
 0x457   : > { %v2233_v2 = vunpack.i.h.bf16 %v2231_v61  ;;  %v2232_v7 = vunpack.i.l.bf16 %v2231_v61 }
 0x459   : > { %v907_v11 = vsel %vm523_vm9, %v2232_v7, %v2233_v2  ;;  %v908_v15 = vsel %vm523_vm9, %v2233_v2, %v906_v60 }
 0x45a   : > { %951 = vmatpush.msrb.mxu0 %v907_v11  ;;  %971 = vmatpush.msrb.mxu1 %v908_v15  ;;  %v870_v17 = vpop.permute.xlu1 %869 }
 0x45c   : > { %952 = vmatpush.msrb.mxu0 %v894_v18  ;;  %972 = vmatpush.msrb.mxu1 %v895_v23 }
 0x45e   : > { %v2241_v29 = vpop.permute.xlu0 %2240  ;;  %953 = vmatpush.msrb.mxu0 %v881_v26  ;;  %973 = vmatpush.msrb.mxu1 %v882_v27 }
 0x45f   : > { %v2243_v34 = vunpack.i.h.bf16 %v2241_v29  ;;  %v2242_v36 = vunpack.i.l.bf16 %v2241_v29 }
 0x461   : > { %v871_v37 = vsel %vm484_vm12, %v2242_v36, %v2243_v34  ;;  %v872_v38 = vsel %vm484_vm12, %v2243_v34, %v870_v17 }
 0x462   : > { %954 = vmatpush.msrb.mxu0 %v871_v37  ;;  %974 = vmatpush.msrb.mxu1 %v872_v38  ;;  %v2246_v40 = vpop.permute.xlu1 %2245 }
 0x463   : > { %v2248_v43 = vunpack.i.h.bf16 %v2246_v40  ;;  %v2247_v45 = vunpack.i.l.bf16 %v2246_v40 }
 0x464   : > { %955 = vmatpush.msrb.mxu0 %v858_v42 }
 0x465   : > { %v845_v46 = vsel %vm456_vm14, %v2247_v45, %v2248_v43  ;;  %v846_v52 = vsel %vm456_vm14, %v2248_v43, %v844_v51  ;;  %v2084_v43 = vld [vmem:[%s3292_s5 + $0x10] sm:$0xff] }
 0x466   : > { %v857_v47 = vpop.permute.xlu0 %856  ;;  %956 = vmatpush.msrb.mxu0 %v845_v46 }
 0x467   : > { %v859_v50 = vsel %vm470_vm13, %v2253_v30, %v857_v47 }
 0x468   : > { %975 = vmatpush.msrb.mxu1 %v859_v50  ;;  %957 = vmatpush.msrb.mxu0 %v816_v48 }
 0x469   : > { %2081 = vmatmul.msk.f32.vlgmr.msrb.gmra.mxu0 %vm558_vm15, %v2079_v49 }
 0x46a   : > { %976 = vmatpush.msrb.mxu1 %v846_v52 }
 0x46c   : > { %977 = vmatpush.msrb.mxu1 %v817_v53 }
 0x46d   : > { %2082 = vmatmul.msk.f32.vlgmr.msrb.gmra.mxu1 %vm558_vm15, %v2079_v49 }
 0x46e   : > { %v937_v14 = vpop.permute.xlu0 %936 }
 0x4e6   : > { %v959_v54 = vpop.f32.mrf.mxu0 }
 0x4e7   : > { %v960_v55 = vadd.f32 %v959_v54, %v937_v14 }
 0x4e9   : > { %v982_v56 = vadd.f32 %v960_v55, %v2683_v63 }
 0x4ea   : > { %v979_v5 = vpop.f32.mrf.mxu1 }
 0x4eb   : > { %v980_v57 = vadd.f32 %v979_v5, %v937_v14  ;;  %vm984_vm6 = vcmp.gt.f32.partialorder %v982_v56, 0.0  ;;  %v986_v58 = vmul.f32 0.2, %v982_v56 }
 0x4ed   : > { %v983_v12 = vadd.f32 %v980_v57, %v2687_v1  ;;  %v2851_v59 = vsel %vm984_vm6, %v982_v56, %v986_v58 }
 0x4ee   : > { %992 = vrot.lane.b32.xlu1 %v2851_v59, %s2465_s21 }
 0x4ef   : > { %vm985_vm2 = vcmp.gt.f32.partialorder %v983_v12, 0.0  ;;  %v987_v0 = vmul.f32 0.2, %v983_v12 }
 0x4f1   : > { %v2855_v60 = vsel %vm985_vm2, %v983_v12, %v987_v0 }
 0x4f2   : > { %994 = vrot.lane.b32.xlu2 %v2855_v60, %s2465_s21 }
 0x54c   : > { %v995_v61 = vpop.permute.xlu2 %994 }
 0x54d   : > { %1002 = vst.msk [vmem:[#allocation3 + $0x10] sm:$0xff] %vm349_vm0, %v995_v61 }
 0x554   : > { %v1013_v63 = vld [vmem:[#allocation3 + $0x10] sm:$0xff] }
 0x555   : > { %1108 = vrot.lane.b32.xlu1 %v1013_v63, %s2470_s25  ;;  %v1028_v1 = vmul.f32 %v1013_v63, %v2579_v16  ;;  %v1022_v62 = vmul.f32 %v1013_v63, %v2589_v21  ;;  %v1025_v36 = vmul.f32 %v1013_v63, %v2583_v19  ;;  %v1016_v38 = vmul.f32 %v1013_v63, %v2636_v41 }
 0x556   : > { %v1019_v42 = vmul.f32 %v1013_v63, %v2614_v31 }
 0x557   : > { %1121 = vrot.lane.b32.xlu2 %v1028_v1, %s2471_s26 }
 0x55d   : > { %1072 = vrot.lane.b32.xlu1 %v1013_v63, %s2472_s27 }
 0x55f   : > { %1085 = vrot.lane.b32.xlu2 %v1022_v62, %s2473_s28 }
 0x560   : > { %v993_v4 = vpop.permute.xlu1 %992 }
 0x561   : > { %1000 = vst.msk [vmem:[#allocation3] sm:$0xff] %vm351_vm1, %v993_v4  ;;  %v2868_v2 = vsel %vm349_vm0, %v993_v4, %v995_v61 }
 0x562   : > { %v1027_v8 = vmul.f32 %v2868_v2, %v2593_v22  ;;  %v1024_v17 = vmul.f32 %v2868_v2, %v2599_v24  ;;  %v1021_v27 = vmul.f32 %v2868_v2, %v2618_v33  ;;  %v1018_v29 = vmul.f32 %v2868_v2, %v2623_v35 }
 0x563   : > { %v1015_v37 = vmul.f32 %v2868_v2, %v2642_v44 }
 0x568   : > { %v2870_v7 = vld [vmem:[#allocation3] sm:$0xff] }
 0x569   : > { %v2255_v9 = vpack.i.bf16 %v2868_v2, %v2870_v7  ;;  %v1026_v11 = vmul.f32 %v2870_v7, %v2566_v10  ;;  %v1023_v15 = vmul.f32 %v2870_v7, %v2570_v13  ;;  %v1020_v25 = vmul.f32 %v2870_v7, %v2587_v20 }
 0x56a   : > { %v1017_v26 = vmul.f32 %v2870_v7, %v2608_v28  ;;  %v1014_v34 = vmul.f32 %v2870_v7, %v2632_v39 }
 0x56b   : > { %2256 = vrot.lane.b32.xlu0 %v2255_v9, %s2470_s25  ;;  %v2265_v18 = vpack.i.bf16 %v1027_v8, %v1026_v11  ;;  %v2270_v23 = vpack.i.bf16 %v1024_v17, %v1023_v15  ;;  %v2275_v30 = vpack.i.bf16 %v1021_v27, %v1020_v25 }
 0x56c   : > { %v2280_v32 = vpack.i.bf16 %v1018_v29, %v1017_v26  ;;  %v2290_v40 = vpack.i.bf16 %v1015_v37, %v1014_v34 }
 0x56d   : > { %2266 = vrot.lane.b32.xlu1 %v2265_v18, %s2471_s26  ;;  %2271 = vrot.lane.b32.xlu2 %v2270_v23, %s2474_s29 }
 0x573   : > { %2261 = vrot.lane.b32.xlu0 %v2255_v9, %s2472_s27 }
 0x575   : > { %2276 = vrot.lane.b32.xlu1 %v2275_v30, %s2473_s28  ;;  %2281 = vrot.lane.b32.xlu2 %v2280_v32, %s2475_s11 }
 0x57b   : > { %1098 = vrot.lane.b32.xlu0 %v1025_v36, %s2474_s29 }
 0x57d   : > { %1049 = vrot.lane.b32.xlu2 %v1016_v38, %s2477_s13  ;;  %2291 = vrot.lane.b32.xlu1 %v2290_v40, %s2477_s13 }
 0x583   : > { %1062 = vrot.lane.b32.xlu0 %v1019_v42, %s2475_s11 }
 0x585   : > { %1129 = vperm.xlu2 %2213, %v2084_v43   ;;  %1036 = vrot.lane.b32.xlu1 %v1013_v63, %s2476_s12 }
 0x58b   : > { %2286 = vrot.lane.b32.xlu0 %v2255_v9, %s2476_s12 }
 0x5b1   : > { %v1122_v45 = vpop.permute.xlu2 %1121 }
 0x5b9   : > { %v1086_v47 = vpop.permute.xlu2 %1085 }
 0x5c7   : > { %v1109_v46 = vpop.permute.xlu1 %1108  ;;  %v2272_v49 = vpop.permute.xlu2 %2271 }
 0x5c8   : > { %v2274_v55 = vunpack.i.h.bf16 %v2272_v49  ;;  %v2273_v56 = vunpack.i.l.bf16 %v2272_v49 }
 0x5ca   : > { %v1100_v61 = vsel %vm523_vm9, %v2273_v56, %v2274_v55 }
 0x5cf   : > { %v1073_v48 = vpop.permute.xlu1 %1072  ;;  %v2282_v63 = vpop.permute.xlu2 %2281 }
 0x5d0   : > { %v2284_v11 = vunpack.i.h.bf16 %v2282_v63  ;;  %v2283_v15 = vunpack.i.l.bf16 %v2282_v63 }
 0x5d2   : > { %v1064_v25 = vsel %vm484_vm12, %v2283_v15, %v2284_v11 }
 0x5d7   : > { %v1050_v40 = vpop.permute.xlu2 %1049 }
 0x5dd   : > { %v2257_v50 = vpop.permute.xlu0 %2256 }
 0x5de   : > { %v2259_v52 = vunpack.i.h.bf16 %v2257_v50  ;;  %v2258_v53 = vunpack.i.l.bf16 %v2257_v50 }
 0x5df   : > { %v2267_v51 = vpop.permute.xlu1 %2266 }
 0x5e0   : > { %v2269_v14 = vunpack.i.h.bf16 %v2267_v51  ;;  %v2268_v54 = vunpack.i.l.bf16 %v2267_v51  ;;  %v1110_v58 = vsel %vm534_vm8, %v2258_v53, %v2259_v52  ;;  %v1111_v12 = vsel %vm534_vm8, %v2259_v52, %v1109_v46  ;;  %v2083_v52 = vld [vmem:[%s3291_s4 + $0x10] sm:$0xff]  ;;  %v1130_v53 = vpop.permute.xlu2 %1129 }
 0x5e1   : > { %v1010_v51 = vmul.f32 %v2868_v2, %v2555_v6 }
 0x5e2   : > { %v1123_v5 = vsel %vm548_vm7, %v2268_v54, %v2269_v14  ;;  %v1124_v57 = vsel %vm548_vm7, %v2269_v14, %v1122_v45 }
 0x5e3   : > { %1142 = vmatpush.msrb.mxu2 %v1123_v5  ;;  %1162 = vmatpush.msrb.mxu3 %v1124_v57 }
 0x5e5   : > { %v2262_v0 = vpop.permute.xlu0 %2261  ;;  %1143 = vmatpush.msrb.mxu2 %v1110_v58  ;;  %1163 = vmatpush.msrb.mxu3 %v1111_v12 }
 0x5e6   : > { %v2264_v62 = vunpack.i.h.bf16 %v2262_v0  ;;  %v2263_v4 = vunpack.i.l.bf16 %v2262_v0 }
 0x5e7   : > { %v2277_v1 = vpop.permute.xlu1 %2276  ;;  %1144 = vmatpush.msrb.mxu2 %v1100_v61 }
 0x5e8   : > { %v2279_v8 = vunpack.i.h.bf16 %v2277_v1  ;;  %v2278_v9 = vunpack.i.l.bf16 %v2277_v1  ;;  %v1074_v18 = vsel %vm495_vm11, %v2263_v4, %v2264_v62  ;;  %v1075_v36 = vsel %vm495_vm11, %v2264_v62, %v1073_v48 }
 0x5e9   : > { %v1009_v48 = vmul.f32 %v2870_v7, %v2545_v3 }
 0x5ea   : > { %v1087_v17 = vsel %vm509_vm10, %v2278_v9, %v2279_v8  ;;  %v1088_v32 = vsel %vm509_vm10, %v2279_v8, %v1086_v47 }
 0x5eb   : > { %1145 = vmatpush.msrb.mxu2 %v1087_v17 }
 0x5ed   : > { %v1099_v23 = vpop.permute.xlu0 %1098  ;;  %1146 = vmatpush.msrb.mxu2 %v1074_v18 }
 0x5ee   : > { %v1101_v26 = vsel %vm523_vm9, %v2274_v55, %v1099_v23 }
 0x5ef   : > { %v2292_v27 = vpop.permute.xlu1 %2291  ;;  %1147 = vmatpush.msrb.mxu2 %v1064_v25  ;;  %1164 = vmatpush.msrb.mxu3 %v1101_v26 }
 0x5f0   : > { %v2294_v29 = vunpack.i.h.bf16 %v2292_v27  ;;  %v2293_v30 = vunpack.i.l.bf16 %v2292_v27 }
 0x5f1   : > { %1165 = vmatpush.msrb.mxu3 %v1088_v32 }
 0x5f2   : > { %v1051_v34 = vsel %vm470_vm13, %v2293_v30, %v2294_v29  ;;  %v1052_v42 = vsel %vm470_vm13, %v2294_v29, %v1050_v40 }
 0x5f3   : > { %1148 = vmatpush.msrb.mxu2 %v1051_v34  ;;  %1166 = vmatpush.msrb.mxu3 %v1075_v36 }
 0x5f5   : > { %v1063_v37 = vpop.permute.xlu0 %1062 }
 0x5f6   : > { %v1065_v38 = vsel %vm484_vm12, %v2284_v11, %v1063_v37 }
 0x5f7   : > { %1167 = vmatpush.msrb.mxu3 %v1065_v38  ;;  %v1037_v49 = vpop.permute.xlu1 %1036 }
 0x5f9   : > { %1168 = vmatpush.msrb.mxu3 %v1052_v42  ;;  %v2088_v42 = vld [vmem:[%s3292_s5 + $0x18] sm:$0xff] }
 0x5fd   : > { %v2287_v43 = vpop.permute.xlu0 %2286 }
 0x5fe   : > { %v2289_v45 = vunpack.i.h.bf16 %v2287_v43  ;;  %v2288_v46 = vunpack.i.l.bf16 %v2287_v43 }
 0x600   : > { %v1038_v47 = vsel %vm456_vm14, %v2288_v46, %v2289_v45  ;;  %v1039_v50 = vsel %vm456_vm14, %v2289_v45, %v1037_v49 }
 0x601   : > { %1149 = vmatpush.msrb.mxu2 %v1038_v47  ;;  %1169 = vmatpush.msrb.mxu3 %v1039_v50 }
 0x603   : > { %1150 = vmatpush.msrb.mxu2 %v1009_v48  ;;  %1170 = vmatpush.msrb.mxu3 %v1010_v51 }
 0x604   : > { %2085 = vmatmul.msk.f32.vlgmr.msrb.gmra.mxu2 %vm558_vm15, %v2083_v52  ;;  %2086 = vmatmul.msk.f32.vlgmr.msrb.gmra.mxu3 %vm558_vm15, %v2083_v52 }
 0x687   : > { %v1152_v14 = vpop.f32.mrf.mxu2  ;;  %v1172_v54 = vpop.f32.mrf.mxu3 }
 0x688   : > { %v1153_v55 = vadd.f32 %v1152_v14, %v1130_v53  ;;  %v1173_v56 = vadd.f32 %v1172_v54, %v1130_v53 }
 0x68a   : > { %v1177_v5 = vmul.f32 0.2, %v1153_v55  ;;  %v1178_v7 = vmul.f32 0.2, %v1173_v56  ;;  %vm1176_vm3 = vcmp.gt.f32.partialorder %v1173_v56, 0.0  ;;  %vm1175_vm4 = vcmp.gt.f32.partialorder %v1153_v55, 0.0 }
 0x68c   : > { %v1180_v2 = vsel %vm1176_vm3, %v1173_v56, %v1178_v7  ;;  %v1179_v57 = vsel %vm1175_vm4, %v1153_v55, %v1177_v5 }
 0x68d   : > { %1185 = vrot.lane.b32.xlu1 %v1180_v2, %s2465_s21  ;;  %1183 = vrot.lane.b32.xlu0 %v1179_v57, %s2465_s21 }
 0x6ff   : > { %v1186_v58 = vpop.permute.xlu1 %1185  ;;  %v1184_v12 = vpop.permute.xlu0 %1183 }
 0x700   : > { %1193 = vst.msk [vmem:[#allocation3 + $0x10] sm:$0xff] %vm349_vm0, %v1186_v58  ;;  %v2942_v61 = vsel %vm349_vm0, %v1184_v12, %v1186_v58 }
 0x701   : > { %1191 = vst.msk [vmem:[#allocation3] sm:$0xff] %vm351_vm1, %v1184_v12  ;;  %v1218_v9 = vmul.f32 %v2942_v61, %v2593_v22  ;;  %v1215_v17 = vmul.f32 %v2942_v61, %v2599_v24  ;;  %v1212_v26 = vmul.f32 %v2942_v61, %v2618_v33  ;;  %v1209_v30 = vmul.f32 %v2942_v61, %v2623_v35 }
 0x702   : > { %v1206_v37 = vmul.f32 %v2942_v61, %v2642_v44 }
 0x707   : > { %v1204_v0 = vld [vmem:[#allocation3 + $0x10] sm:$0xff] }
 0x708   : > { %1299 = vrot.lane.b32.xlu2 %v1204_v0, %s2470_s25  ;;  %v1219_v63 = vmul.f32 %v1204_v0, %v2579_v16  ;;  %v2946_v1 = vld [vmem:[#allocation3] sm:$0xff]  ;;  %v1213_v4 = vmul.f32 %v1204_v0, %v2589_v21  ;;  %v1216_v23 = vmul.f32 %v1204_v0, %v2583_v19  ;;  %v1210_v34 = vmul.f32 %v1204_v0, %v2614_v31 }
 0x709   : > { %v2295_v62 = vpack.i.bf16 %v2942_v61, %v2946_v1  ;;  %v1217_v8 = vmul.f32 %v2946_v1, %v2566_v10  ;;  %v1214_v11 = vmul.f32 %v2946_v1, %v2570_v13  ;;  %v1211_v25 = vmul.f32 %v2946_v1, %v2587_v20 }
 0x70a   : > { %1312 = vrot.lane.b32.xlu0 %v1219_v63, %s2471_s26  ;;  %v1208_v27 = vmul.f32 %v2946_v1, %v2608_v28  ;;  %v1205_v36 = vmul.f32 %v2946_v1, %v2632_v39  ;;  %v1207_v40 = vmul.f32 %v1204_v0, %v2636_v41 }
 0x70b   : > { %2296 = vrot.lane.b32.xlu1 %v2295_v62, %s2470_s25  ;;  %v2305_v15 = vpack.i.bf16 %v1218_v9, %v1217_v8  ;;  %v2310_v18 = vpack.i.bf16 %v1215_v17, %v1214_v11  ;;  %v2315_v29 = vpack.i.bf16 %v1212_v26, %v1211_v25 }
 0x70c   : > { %v2320_v32 = vpack.i.bf16 %v1209_v30, %v1208_v27  ;;  %v2330_v38 = vpack.i.bf16 %v1206_v37, %v1205_v36 }
 0x710   : > { %1263 = vrot.lane.b32.xlu2 %v1204_v0, %s2472_s27 }
 0x712   : > { %1276 = vrot.lane.b32.xlu0 %v1213_v4, %s2473_s28 }
 0x713   : > { %2301 = vrot.lane.b32.xlu1 %v2295_v62, %s2472_s27 }
 0x718   : > { %2306 = vrot.lane.b32.xlu2 %v2305_v15, %s2471_s26 }
 0x71a   : > { %2311 = vrot.lane.b32.xlu0 %v2310_v18, %s2474_s29 }
 0x71b   : > { %1289 = vrot.lane.b32.xlu1 %v1216_v23, %s2474_s29 }
 0x720   : > { %2316 = vrot.lane.b32.xlu2 %v2315_v29, %s2473_s28 }
 0x722   : > { %2321 = vrot.lane.b32.xlu0 %v2320_v32, %s2475_s11 }
 0x723   : > { %1253 = vrot.lane.b32.xlu1 %v1210_v34, %s2475_s11 }
 0x728   : > { %2331 = vrot.lane.b32.xlu2 %v2330_v38, %s2477_s13 }
 0x72a   : > { %1240 = vrot.lane.b32.xlu0 %v1207_v40, %s2477_s13 }
 0x72b   : > { %2326 = vrot.lane.b32.xlu1 %v2295_v62, %s2476_s12 }
 0x730   : > { %1227 = vrot.lane.b32.xlu2 %v1204_v0, %s2476_s12 }
 0x732   : > { %1320 = vperm.xlu0 %2254, %v2088_v42  }
 0x762   : > { %v1300_v43 = vpop.permute.xlu2 %1299 }
 0x76a   : > { %v1264_v45 = vpop.permute.xlu2 %1263 }
 0x772   : > { %v2307_v46 = vpop.permute.xlu2 %2306 }
 0x773   : > { %v2309_v49 = vunpack.i.h.bf16 %v2307_v46  ;;  %v2308_v47 = vunpack.i.l.bf16 %v2307_v46 }
 0x775   : > { %v1314_v50 = vsel %vm548_vm7, %v2308_v47, %v2309_v49 }
 0x776   : > { %1333 = vmatpush.msra.mxu0 %v1314_v50  ;;  %v1200_v50 = vmul.f32 %v2946_v1, %v2545_v3 }
 0x77a   : > { %v2317_v7 = vpop.permute.xlu2 %2316 }
 0x77b   : > { %v2319_v57 = vunpack.i.h.bf16 %v2317_v7  ;;  %v2318_v58 = vunpack.i.l.bf16 %v2317_v7 }
 0x77c   : > { %v1313_v48 = vpop.permute.xlu0 %1312 }
 0x77d   : > { %v1315_v51 = vsel %vm548_vm7, %v2309_v49, %v1313_v48  ;;  %v2297_v52 = vpop.permute.xlu1 %2296  ;;  %v1278_v11 = vsel %vm509_vm10, %v2318_v58, %v2319_v57  ;;  %v1201_v48 = vmul.f32 %v2942_v61, %v2555_v6 }
 0x77e   : > { %v2299_v53 = vunpack.i.h.bf16 %v2297_v52  ;;  %v2298_v14 = vunpack.i.l.bf16 %v2297_v52  ;;  %1353 = vmatpush.msra.mxu1 %v1315_v51  ;;  %v2087_v51 = vld [vmem:[%s3291_s4 + $0x18] sm:$0xff] }
 0x780   : > { %v1301_v54 = vsel %vm534_vm8, %v2298_v14, %v2299_v53  ;;  %v1302_v55 = vsel %vm534_vm8, %v2299_v53, %v1300_v43 }
 0x781   : > { %1334 = vmatpush.msra.mxu0 %v1301_v54  ;;  %1354 = vmatpush.msra.mxu1 %v1302_v55 }
 0x782   : > { %v2332_v17 = vpop.permute.xlu2 %2331 }
 0x783   : > { %v2334_v26 = vunpack.i.h.bf16 %v2332_v17  ;;  %v2333_v27 = vunpack.i.l.bf16 %v2332_v17 }
 0x784   : > { %v1277_v56 = vpop.permute.xlu0 %1276 }
 0x785   : > { %v2302_v5 = vpop.permute.xlu1 %2301  ;;  %v1279_v15 = vsel %vm509_vm10, %v2319_v57, %v1277_v56  ;;  %v1242_v37 = vsel %vm470_vm13, %v2333_v27, %v2334_v26 }
 0x786   : > { %v2304_v62 = vunpack.i.h.bf16 %v2302_v5  ;;  %v2303_v4 = vunpack.i.l.bf16 %v2302_v5 }
 0x788   : > { %v1265_v18 = vsel %vm495_vm11, %v2303_v4, %v2304_v62  ;;  %v1266_v23 = vsel %vm495_vm11, %v2304_v62, %v1264_v45 }
 0x78a   : > { %v1228_v46 = vpop.permute.xlu2 %1227 }
 0x78c   : > { %v2312_v2 = vpop.permute.xlu0 %2311 }
 0x78d   : > { %v2314_v12 = vunpack.i.h.bf16 %v2312_v2  ;;  %v2313_v0 = vunpack.i.l.bf16 %v2312_v2  ;;  %v1290_v63 = vpop.permute.xlu1 %1289 }
 0x78f   : > { %v1291_v8 = vsel %vm523_vm9, %v2313_v0, %v2314_v12  ;;  %v1292_v9 = vsel %vm523_vm9, %v2314_v12, %v1290_v63 }
 0x790   : > { %1335 = vmatpush.msra.mxu0 %v1291_v8  ;;  %1355 = vmatpush.msra.mxu1 %v1292_v9 }
 0x792   : > { %1336 = vmatpush.msra.mxu0 %v1278_v11  ;;  %1356 = vmatpush.msra.mxu1 %v1279_v15 }
 0x794   : > { %v2322_v25 = vpop.permute.xlu0 %2321  ;;  %1337 = vmatpush.msra.mxu0 %v1265_v18  ;;  %1357 = vmatpush.msra.mxu1 %v1266_v23 }
 0x795   : > { %v2324_v29 = vunpack.i.h.bf16 %v2322_v25  ;;  %v2323_v30 = vunpack.i.l.bf16 %v2322_v25  ;;  %v1254_v32 = vpop.permute.xlu1 %1253 }
 0x797   : > { %v1255_v34 = vsel %vm484_vm12, %v2323_v30, %v2324_v29  ;;  %v1256_v36 = vsel %vm484_vm12, %v2324_v29, %v1254_v32 }
 0x798   : > { %1338 = vmatpush.msra.mxu0 %v1255_v34  ;;  %1358 = vmatpush.msra.mxu1 %v1256_v36 }
 0x79a   : > { %1339 = vmatpush.msra.mxu0 %v1242_v37 }
 0x79c   : > { %v1241_v38 = vpop.permute.xlu0 %1240 }
 0x79d   : > { %v2327_v40 = vpop.permute.xlu1 %2326  ;;  %v1243_v42 = vsel %vm470_vm13, %v2334_v26, %v1241_v38 }
 0x79e   : > { %v2329_v43 = vunpack.i.h.bf16 %v2327_v40  ;;  %v2328_v45 = vunpack.i.l.bf16 %v2327_v40  ;;  %1359 = vmatpush.msra.mxu1 %v1243_v42  ;;  %v2092_v40 = vld [vmem:[%s3292_s5 + $0x20] sm:$0xff] }
 0x7a0   : > { %v1229_v49 = vsel %vm456_vm14, %v2328_v45, %v2329_v43  ;;  %v1230_v47 = vsel %vm456_vm14, %v2329_v43, %v1228_v46 }
 0x7a1   : > { %1340 = vmatpush.msra.mxu0 %v1229_v49  ;;  %1360 = vmatpush.msra.mxu1 %v1230_v47 }
 0x7a3   : > { %1341 = vmatpush.msra.mxu0 %v1200_v50  ;;  %1361 = vmatpush.msra.mxu1 %v1201_v48 }
 0x7a4   : > { %2089 = vmatmul.msk.f32.vlgmr.msra.gmra.mxu0 %vm558_vm15, %v2087_v51  ;;  %2090 = vmatmul.msk.f32.vlgmr.msra.gmra.mxu1 %vm558_vm15, %v2087_v51  ;;  %v1321_v52 = vpop.permute.xlu0 %1320 }
 0x821   : > { %v1343_v53 = vpop.f32.mrf.mxu0  ;;  %v1363_v14 = vpop.f32.mrf.mxu1 }
 0x822   : > { %v1344_v54 = vadd.f32 %v1343_v53, %v1321_v52  ;;  %v1364_v55 = vadd.f32 %v1363_v14, %v1321_v52 }
 0x824   : > { %v1366_v1 = vadd.f32 %v1344_v54, %v2851_v59  ;;  %v1367_v56 = vadd.f32 %v1364_v55, %v2855_v60 }
 0x826   : > { %vm1369_vm5 = vcmp.gt.f32.partialorder %v1367_v56, 0.0  ;;  %v1371_v61 = vmul.f32 0.2, %v1367_v56  ;;  %vm1368_vm6 = vcmp.gt.f32.partialorder %v1366_v1, 0.0  ;;  %v1370_v5 = vmul.f32 0.2, %v1366_v1 }
 0x828   : > { %v3019_v7 = vsel %vm1369_vm5, %v1367_v56, %v1371_v61  ;;  %v3021_v2 = vsel %vm1368_vm6, %v1366_v1, %v1370_v5 }
 0x829   : > { %1378 = vrot.lane.b32.xlu2 %v3019_v7, %s2465_s21  ;;  %1376 = vrot.lane.b32.xlu1 %v3021_v2, %s2465_s21 }
 0x883   : > { %v1379_v57 = vpop.permute.xlu2 %1378 }
 0x884   : > { %1386 = vst.msk [vmem:[#allocation3 + $0x10] sm:$0xff] %vm349_vm0, %v1379_v57 }
 0x88b   : > { %v1397_v59 = vld [vmem:[#allocation3 + $0x10] sm:$0xff] }
 0x88c   : > { %1492 = vrot.lane.b32.xlu0 %v1397_v59, %s2470_s25  ;;  %v1412_v60 = vmul.f32 %v1397_v59, %v2579_v16  ;;  %v1406_v58 = vmul.f32 %v1397_v59, %v2589_v21  ;;  %v1409_v32 = vmul.f32 %v1397_v59, %v2583_v19  ;;  %v1400_v36 = vmul.f32 %v1397_v59, %v2636_v41 }
 0x88d   : > { %v1403_v38 = vmul.f32 %v1397_v59, %v2614_v31 }
 0x88e   : > { %1505 = vrot.lane.b32.xlu1 %v1412_v60, %s2471_s26 }
 0x894   : > { %1456 = vrot.lane.b32.xlu0 %v1397_v59, %s2472_s27 }
 0x896   : > { %1469 = vrot.lane.b32.xlu1 %v1406_v58, %s2473_s28 }
 0x89b   : > { %v1377_v12 = vpop.permute.xlu1 %1376 }
 0x89c   : > { %1384 = vst.msk [vmem:[#allocation3] sm:$0xff] %vm351_vm1, %v1377_v12  ;;  %v3036_v0 = vsel %vm349_vm0, %v1377_v12, %v1379_v57 }
 0x89d   : > { %v1411_v62 = vmul.f32 %v3036_v0, %v2593_v22  ;;  %v1408_v11 = vmul.f32 %v3036_v0, %v2599_v24  ;;  %v1405_v25 = vmul.f32 %v3036_v0, %v2618_v33  ;;  %v1402_v26 = vmul.f32 %v3036_v0, %v2623_v35 }
 0x89e   : > { %v1399_v34 = vmul.f32 %v3036_v0, %v2642_v44 }
 0x8a3   : > { %v3038_v63 = vld [vmem:[#allocation3] sm:$0xff] }
 0x8a4   : > { %v2335_v4 = vpack.i.bf16 %v3036_v0, %v3038_v63  ;;  %v1410_v8 = vmul.f32 %v3038_v63, %v2566_v10  ;;  %v1407_v9 = vmul.f32 %v3038_v63, %v2570_v13  ;;  %v1404_v18 = vmul.f32 %v3038_v63, %v2587_v20 }
 0x8a5   : > { %v1401_v23 = vmul.f32 %v3038_v63, %v2608_v28  ;;  %v1398_v30 = vmul.f32 %v3038_v63, %v2632_v39 }
 0x8a6   : > { %2336 = vrot.lane.b32.xlu2 %v2335_v4, %s2470_s25  ;;  %v2345_v15 = vpack.i.bf16 %v1411_v62, %v1410_v8  ;;  %v2350_v17 = vpack.i.bf16 %v1408_v11, %v1407_v9  ;;  %v2355_v27 = vpack.i.bf16 %v1405_v25, %v1404_v18 }
 0x8a7   : > { %v2360_v29 = vpack.i.bf16 %v1402_v26, %v1401_v23  ;;  %v2370_v37 = vpack.i.bf16 %v1399_v34, %v1398_v30 }
 0x8a8   : > { %2346 = vrot.lane.b32.xlu0 %v2345_v15, %s2471_s26  ;;  %2351 = vrot.lane.b32.xlu1 %v2350_v17, %s2474_s29 }
 0x8ae   : > { %2341 = vrot.lane.b32.xlu2 %v2335_v4, %s2472_s27 }
 0x8b0   : > { %2356 = vrot.lane.b32.xlu0 %v2355_v27, %s2473_s28  ;;  %2361 = vrot.lane.b32.xlu1 %v2360_v29, %s2475_s11 }
 0x8b6   : > { %1482 = vrot.lane.b32.xlu2 %v1409_v32, %s2474_s29 }
 0x8b8   : > { %1433 = vrot.lane.b32.xlu1 %v1400_v36, %s2477_s13  ;;  %2371 = vrot.lane.b32.xlu0 %v2370_v37, %s2477_s13 }
 0x8be   : > { %1446 = vrot.lane.b32.xlu2 %v1403_v38, %s2475_s11 }
 0x8c0   : > { %1513 = vperm.xlu1 %2172, %v2092_v40   ;;  %1420 = vrot.lane.b32.xlu0 %v1397_v59, %s2476_s12 }
 0x8c6   : > { %2366 = vrot.lane.b32.xlu2 %v2335_v4, %s2476_s12 }
 0x8fe   : > { %v1493_v43 = vpop.permute.xlu0 %1492 }
 0x900   : > { %v2337_v42 = vpop.permute.xlu2 %2336  ;;  %v1506_v45 = vpop.permute.xlu1 %1505 }
 0x901   : > { %v2339_v52 = vunpack.i.h.bf16 %v2337_v42  ;;  %v2338_v53 = vunpack.i.l.bf16 %v2337_v42 }
 0x903   : > { %v1494_v57 = vsel %vm534_vm8, %v2338_v53, %v2339_v52  ;;  %v1495_v59 = vsel %vm534_vm8, %v2339_v52, %v1493_v43 }
 0x906   : > { %v1457_v49 = vpop.permute.xlu0 %1456 }
 0x908   : > { %v2342_v46 = vpop.permute.xlu2 %2341  ;;  %v1470_v47 = vpop.permute.xlu1 %1469 }
 0x909   : > { %v2344_v4 = vunpack.i.h.bf16 %v2342_v46  ;;  %v2343_v8 = vunpack.i.l.bf16 %v2342_v46  ;;  %v1393_v46 = vmul.f32 %v3038_v63, %v2545_v3 }
 0x90b   : > { %v1458_v25 = vsel %vm495_vm11, %v2343_v8, %v2344_v4  ;;  %v1459_v26 = vsel %vm495_vm11, %v2344_v4, %v1457_v49  ;;  %v2091_v49 = vld [vmem:[%s3291_s4 + $0x20] sm:$0xff] }
 0x910   : > { %v1483_v50 = vpop.permute.xlu2 %1482 }
 0x918   : > { %v1447_v5 = vpop.permute.xlu2 %1446 }
 0x91a   : > { %v2347_v48 = vpop.permute.xlu0 %2346  ;;  %v2352_v51 = vpop.permute.xlu1 %2351 }
 0x91b   : > { %v2349_v14 = vunpack.i.h.bf16 %v2347_v48  ;;  %v2348_v54 = vunpack.i.l.bf16 %v2347_v48  ;;  %v2354_v55 = vunpack.i.h.bf16 %v2352_v51  ;;  %v2353_v1 = vunpack.i.l.bf16 %v2352_v51 }
 0x91c   : > { %v1394_v48 = vmul.f32 %v3036_v0, %v2555_v6 }
 0x91d   : > { %v1507_v56 = vsel %vm548_vm7, %v2348_v54, %v2349_v14  ;;  %v1508_v61 = vsel %vm548_vm7, %v2349_v14, %v1506_v45  ;;  %v1484_v60 = vsel %vm523_vm9, %v2353_v1, %v2354_v55  ;;  %v1485_v58 = vsel %vm523_vm9, %v2354_v55, %v1483_v50 }
 0x91e   : > { %1526 = vmatpush.msra.mxu2 %v1507_v56  ;;  %1546 = vmatpush.msra.mxu3 %v1508_v61 }
 0x920   : > { %1527 = vmatpush.msra.mxu2 %v1494_v57  ;;  %1547 = vmatpush.msra.mxu3 %v1495_v59  ;;  %v2367_v27 = vpop.permute.xlu2 %2366 }
 0x921   : > { %v2369_v34 = vunpack.i.h.bf16 %v2367_v27  ;;  %v2368_v36 = vunpack.i.l.bf16 %v2367_v27 }
 0x922   : > { %v2357_v12 = vpop.permute.xlu0 %2356  ;;  %v2362_v62 = vpop.permute.xlu1 %2361  ;;  %1528 = vmatpush.msra.mxu2 %v1484_v60  ;;  %1548 = vmatpush.msra.mxu3 %v1485_v58 }
 0x923   : > { %v2359_v9 = vunpack.i.h.bf16 %v2357_v12  ;;  %v2358_v11 = vunpack.i.l.bf16 %v2357_v12  ;;  %v2364_v15 = vunpack.i.h.bf16 %v2362_v62  ;;  %v2363_v17 = vunpack.i.l.bf16 %v2362_v62 }
 0x924   : > { %v1422_v45 = vsel %vm456_vm14, %v2368_v36, %v2369_v34 }
 0x925   : > { %v1471_v18 = vsel %vm509_vm10, %v2358_v11, %v2359_v9  ;;  %v1472_v23 = vsel %vm509_vm10, %v2359_v9, %v1470_v47  ;;  %v1448_v29 = vsel %vm484_vm12, %v2363_v17, %v2364_v15  ;;  %v1449_v30 = vsel %vm484_vm12, %v2364_v15, %v1447_v5 }
 0x926   : > { %1529 = vmatpush.msra.mxu2 %v1471_v18  ;;  %1549 = vmatpush.msra.mxu3 %v1472_v23 }
 0x928   : > { %1530 = vmatpush.msra.mxu2 %v1458_v25  ;;  %1550 = vmatpush.msra.mxu3 %v1459_v26 }
 0x92a   : > { %v2372_v32 = vpop.permute.xlu0 %2371  ;;  %1531 = vmatpush.msra.mxu2 %v1448_v29  ;;  %1551 = vmatpush.msra.mxu3 %v1449_v30  ;;  %v1434_v40 = vpop.permute.xlu1 %1433 }
 0x92b   : > { %v2374_v37 = vunpack.i.h.bf16 %v2372_v32  ;;  %v2373_v38 = vunpack.i.l.bf16 %v2372_v32 }
 0x92d   : > { %v1435_v42 = vsel %vm470_vm13, %v2373_v38, %v2374_v37  ;;  %v1436_v43 = vsel %vm470_vm13, %v2374_v37, %v1434_v40  ;;  %v2096_v38 = vld [vmem:[%s3292_s5 + $0x28] sm:$0xff] }
 0x92e   : > { %1532 = vmatpush.msra.mxu2 %v1435_v42  ;;  %1552 = vmatpush.msra.mxu3 %v1436_v43 }
 0x930   : > { %1533 = vmatpush.msra.mxu2 %v1422_v45 }
 0x932   : > { %v1421_v47 = vpop.permute.xlu0 %1420  ;;  %1534 = vmatpush.msra.mxu2 %v1393_v46  ;;  %v1514_v51 = vpop.permute.xlu1 %1513 }
 0x933   : > { %2093 = vmatmul.msk.f32.vlgmr.msra.gmra.mxu2 %vm558_vm15, %v2091_v49  ;;  %v1423_v50 = vsel %vm456_vm14, %v2369_v34, %v1421_v47 }
 0x934   : > { %1553 = vmatpush.msra.mxu3 %v1423_v50 }
 0x936   : > { %1554 = vmatpush.msra.mxu3 %v1394_v48 }
 0x937   : > { %2094 = vmatmul.msk.f32.vlgmr.msra.gmra.mxu3 %vm558_vm15, %v2091_v49 }
 0x9b6   : > { %v1536_v52 = vpop.f32.mrf.mxu2 }
 0x9b7   : > { %v1537_v63 = vadd.f32 %v1536_v52, %v1514_v51 }
 0x9b9   : > { %v1561_v53 = vmul.f32 0.2, %v1537_v63  ;;  %vm1559_vm2 = vcmp.gt.f32.partialorder %v1537_v63, 0.0 }
 0x9ba   : > { %v1556_v14 = vpop.f32.mrf.mxu3 }
 0x9bb   : > { %v1557_v54 = vadd.f32 %v1556_v14, %v1514_v51  ;;  %v1563_v55 = vsel %vm1559_vm2, %v1537_v63, %v1561_v53 }
 0x9bc   : > { %1567 = vrot.lane.b32.xlu2 %v1563_v55, %s2465_s21 }
 0x9bd   : > { %v1562_v1 = vmul.f32 0.2, %v1557_v54  ;;  %vm1560_vm3 = vcmp.gt.f32.partialorder %v1557_v54, 0.0 }
 0x9bf   : > { %v1564_v56 = vsel %vm1560_vm3, %v1557_v54, %v1562_v1 }
 0x9c0   : > { %1569 = vrot.lane.b32.xlu0 %v1564_v56, %s2465_s21 }
 0xa16   : > { %v1568_v61 = vpop.permute.xlu2 %1567 }
 0xa17   : > { %1575 = vst.msk [vmem:[#allocation3] sm:$0xff] %vm351_vm1, %v1568_v61 }
 0xa1e   : > { %v3112_v57 = vld [vmem:[#allocation3] sm:$0xff] }
 0xa1f   : > { %v1601_v8 = vmul.f32 %v3112_v57, %v2566_v10  ;;  %v1598_v15 = vmul.f32 %v3112_v57, %v2570_v13  ;;  %v1595_v25 = vmul.f32 %v3112_v57, %v2587_v20  ;;  %v1592_v29 = vmul.f32 %v3112_v57, %v2608_v28 }
 0xa20   : > { %v1589_v34 = vmul.f32 %v3112_v57, %v2632_v39 }
 0xa32   : > { %v1570_v0 = vpop.permute.xlu0 %1569 }
 0xa33   : > { %v3109_v5 = vsel %vm349_vm0, %v1568_v61, %v1570_v0  ;;  %1577 = vst.msk [vmem:[#allocation3 + $0x10] sm:$0xff] %vm349_vm0, %v1570_v0 }
 0xa34   : > { %v2375_v59 = vpack.i.bf16 %v3109_v5, %v3112_v57  ;;  %v1602_v4 = vmul.f32 %v3109_v5, %v2593_v22  ;;  %v1599_v9 = vmul.f32 %v3109_v5, %v2599_v24  ;;  %v1596_v23 = vmul.f32 %v3109_v5, %v2618_v33 }
 0xa35   : > { %v1593_v26 = vmul.f32 %v3109_v5, %v2623_v35  ;;  %v1590_v32 = vmul.f32 %v3109_v5, %v2642_v44 }
 0xa36   : > { %2376 = vrot.lane.b32.xlu0 %v2375_v59, %s2470_s25  ;;  %v2385_v11 = vpack.i.bf16 %v1602_v4, %v1601_v8  ;;  %v2390_v17 = vpack.i.bf16 %v1599_v9, %v1598_v15  ;;  %v2395_v27 = vpack.i.bf16 %v1596_v23, %v1595_v25 }
 0xa37   : > { %v2400_v30 = vpack.i.bf16 %v1593_v26, %v1592_v29  ;;  %v2410_v36 = vpack.i.bf16 %v1590_v32, %v1589_v34 }
 0xa3a   : > { %v1588_v60 = vld [vmem:[#allocation3 + $0x10] sm:$0xff] }
 0xa3b   : > { %1683 = vrot.lane.b32.xlu1 %v1588_v60, %s2470_s25  ;;  %v1603_v58 = vmul.f32 %v1588_v60, %v2579_v16  ;;  %v1597_v12 = vmul.f32 %v1588_v60, %v2589_v21  ;;  %v1600_v62 = vmul.f32 %v1588_v60, %v2583_v19  ;;  %v1594_v18 = vmul.f32 %v1588_v60, %v2614_v31 }
 0xa3c   : > { %v1591_v37 = vmul.f32 %v1588_v60, %v2636_v41 }
 0xa3d   : > { %1696 = vrot.lane.b32.xlu2 %v1603_v58, %s2471_s26 }
 0xa3e   : > { %2381 = vrot.lane.b32.xlu0 %v2375_v59, %s2472_s27 }
 0xa43   : > { %1647 = vrot.lane.b32.xlu1 %v1588_v60, %s2472_s27 }
 0xa45   : > { %1660 = vrot.lane.b32.xlu2 %v1597_v12, %s2473_s28 }
 0xa46   : > { %1673 = vrot.lane.b32.xlu0 %v1600_v62, %s2474_s29 }
 0xa4b   : > { %2386 = vrot.lane.b32.xlu1 %v2385_v11, %s2471_s26 }
 0xa4d   : > { %2391 = vrot.lane.b32.xlu2 %v2390_v17, %s2474_s29 }
 0xa4e   : > { %1637 = vrot.lane.b32.xlu0 %v1594_v18, %s2475_s11 }
 0xa53   : > { %2396 = vrot.lane.b32.xlu1 %v2395_v27, %s2473_s28 }
 0xa55   : > { %2401 = vrot.lane.b32.xlu2 %v2400_v30, %s2475_s11 }
 0xa56   : > { %2406 = vrot.lane.b32.xlu0 %v2375_v59, %s2476_s12 }
 0xa5b   : > { %2411 = vrot.lane.b32.xlu1 %v2410_v36, %s2477_s13 }
 0xa5d   : > { %1624 = vrot.lane.b32.xlu2 %v1591_v37, %s2477_s13 }
 0xa63   : > { %1611 = vrot.lane.b32.xlu1 %v1588_v60, %s2476_s12 }
 0xa65   : > { %1704 = vperm.xlu2 %2213, %v2096_v38  }
 0xa97   : > { %v1697_v40 = vpop.permute.xlu2 %1696 }
 0xa9f   : > { %v1661_v46 = vpop.permute.xlu2 %1660 }
 0xaa7   : > { %v2392_v50 = vpop.permute.xlu2 %2391 }
 0xaa8   : > { %v2377_v42 = vpop.permute.xlu0 %2376  ;;  %v2394_v14 = vunpack.i.h.bf16 %v2392_v50  ;;  %v2393_v54 = vunpack.i.l.bf16 %v2392_v50  ;;  %v1585_v50 = vmul.f32 %v3109_v5, %v2555_v6 }
 0xaa9   : > { %v2379_v51 = vunpack.i.h.bf16 %v2377_v42  ;;  %v2378_v52 = vunpack.i.l.bf16 %v2377_v42 }
 0xaaa   : > { %v1675_v59 = vsel %vm523_vm9, %v2393_v54, %v2394_v14 }
 0xaab   : > { %v1685_v61 = vsel %vm534_vm8, %v2378_v52, %v2379_v51 }
 0xaad   : > { %v1684_v43 = vpop.permute.xlu1 %1683 }
 0xaae   : > { %v1686_v0 = vsel %vm534_vm8, %v2379_v51, %v1684_v43 }
 0xaaf   : > { %v2402_v58 = vpop.permute.xlu2 %2401 }
 0xab0   : > { %v2382_v45 = vpop.permute.xlu0 %2381  ;;  %v2404_v11 = vunpack.i.h.bf16 %v2402_v58  ;;  %v2403_v15 = vunpack.i.l.bf16 %v2402_v58 }
 0xab1   : > { %v2384_v62 = vunpack.i.h.bf16 %v2382_v45  ;;  %v2383_v4 = vunpack.i.l.bf16 %v2382_v45  ;;  %v1584_v45 = vmul.f32 %v3112_v57, %v2545_v3 }
 0xab2   : > { %v1639_v27 = vsel %vm484_vm12, %v2403_v15, %v2404_v11 }
 0xab3   : > { %v1649_v23 = vsel %vm495_vm11, %v2383_v4, %v2384_v62 }
 0xab5   : > { %v1648_v49 = vpop.permute.xlu1 %1647 }
 0xab6   : > { %v1650_v25 = vsel %vm495_vm11, %v2384_v62, %v1648_v49 }
 0xab7   : > { %v1625_v38 = vpop.permute.xlu2 %1624 }
 0xab8   : > { %v1674_v47 = vpop.permute.xlu0 %1673 }
 0xab9   : > { %v1676_v60 = vsel %vm523_vm9, %v2394_v14, %v1674_v47 }
 0xabd   : > { %v2387_v48 = vpop.permute.xlu1 %2386 }
 0xabe   : > { %v2389_v63 = vunpack.i.h.bf16 %v2387_v48  ;;  %v2388_v53 = vunpack.i.l.bf16 %v2387_v48 }
 0xabf   : > { %v1705_v48 = vpop.permute.xlu2 %1704 }
 0xac0   : > { %v1698_v55 = vsel %vm548_vm7, %v2388_v53, %v2389_v63  ;;  %v1699_v1 = vsel %vm548_vm7, %v2389_v63, %v1697_v40  ;;  %v1638_v56 = vpop.permute.xlu0 %1637 }
 0xac1   : > { %1717 = vmatpush.msrb.mxu0 %v1698_v55  ;;  %1737 = vmatpush.msrb.mxu1 %v1699_v1  ;;  %v1640_v29 = vsel %vm484_vm12, %v2404_v11, %v1638_v56 }
 0xac3   : > { %1718 = vmatpush.msrb.mxu0 %v1685_v61  ;;  %1738 = vmatpush.msrb.mxu1 %v1686_v0 }
 0xac5   : > { %v2397_v12 = vpop.permute.xlu1 %2396  ;;  %1719 = vmatpush.msrb.mxu0 %v1675_v59  ;;  %1739 = vmatpush.msrb.mxu1 %v1676_v60 }
 0xac6   : > { %v2399_v8 = vunpack.i.h.bf16 %v2397_v12  ;;  %v2398_v9 = vunpack.i.l.bf16 %v2397_v12 }
 0xac8   : > { %v1662_v17 = vsel %vm509_vm10, %v2398_v9, %v2399_v8  ;;  %v1663_v18 = vsel %vm509_vm10, %v2399_v8, %v1661_v46  ;;  %v2407_v26 = vpop.permute.xlu0 %2406  ;;  %v2095_v46 = vld [vmem:[%s3291_s4 + $0x28] sm:$0xff] }
 0xac9   : > { %1720 = vmatpush.msrb.mxu0 %v1662_v17  ;;  %1740 = vmatpush.msrb.mxu1 %v1663_v18  ;;  %v2409_v36 = vunpack.i.h.bf16 %v2407_v26  ;;  %v2408_v37 = vunpack.i.l.bf16 %v2407_v26 }
 0xacb   : > { %1721 = vmatpush.msrb.mxu0 %v1649_v23  ;;  %1741 = vmatpush.msrb.mxu1 %v1650_v25  ;;  %v1613_v43 = vsel %vm456_vm14, %v2408_v37, %v2409_v36 }
 0xacd   : > { %v2412_v30 = vpop.permute.xlu1 %2411  ;;  %1722 = vmatpush.msrb.mxu0 %v1639_v27  ;;  %1742 = vmatpush.msrb.mxu1 %v1640_v29 }
 0xace   : > { %v2414_v32 = vunpack.i.h.bf16 %v2412_v30  ;;  %v2413_v34 = vunpack.i.l.bf16 %v2412_v30 }
 0xad0   : > { %v1626_v40 = vsel %vm470_vm13, %v2413_v34, %v2414_v32  ;;  %v1627_v42 = vsel %vm470_vm13, %v2414_v32, %v1625_v38 }
 0xad1   : > { %1723 = vmatpush.msrb.mxu0 %v1626_v40  ;;  %1743 = vmatpush.msrb.mxu1 %v1627_v42 }
 0xad3   : > { %1724 = vmatpush.msrb.mxu0 %v1613_v43 }
 0xad5   : > { %v1612_v49 = vpop.permute.xlu1 %1611  ;;  %1725 = vmatpush.msrb.mxu0 %v1584_v45 }
 0xad6   : > { %2097 = vmatmul.msk.f32.vlgmr.msrb.gmra.mxu0 %vm558_vm15, %v2095_v46  ;;  %v1614_v47 = vsel %vm456_vm14, %v2409_v36, %v1612_v49 }
 0xad7   : > { %1744 = vmatpush.msrb.mxu1 %v1614_v47 }
 0xad9   : > { %1745 = vmatpush.msrb.mxu1 %v1585_v50 }
 0xada   : > { %2098 = vmatmul.msk.f32.vlgmr.msrb.gmra.mxu1 %vm558_vm15, %v2095_v46 }
 0xb53   : > { %v1727_v51 = vpop.f32.mrf.mxu0 }
 0xb54   : > { %v1728_v57 = vadd.f32 %v1727_v51, %v1705_v48 }
 0xb56   : > { %v1750_v52 = vadd.f32 %v1728_v57, %v3021_v2 }
 0xb57   : > { %v1747_v63 = vpop.f32.mrf.mxu1 }
 0xb58   : > { %v1748_v53 = vadd.f32 %v1747_v63, %v1705_v48  ;;  %vm1752_vm4 = vcmp.gt.f32.partialorder %v1750_v52, 0.0  ;;  %v1754_v14 = vmul.f32 0.2, %v1750_v52 }
 0xb5a   : > { %v1751_v54 = vadd.f32 %v1748_v53, %v3019_v7  ;;  %v1756_v5 = vsel %vm1752_vm4, %v1750_v52, %v1754_v14 }
 0xb5b   : > { %1762 = vrot.lane.b32.xlu0 %v1756_v5, %s2465_s21  ;;  %1758 = vst [vmem:[%s345_s18] sm:$0xff] %v1756_v5 }
 0xb5c   : > { %vm1753_vm5 = vcmp.gt.f32.partialorder %v1751_v54, 0.0  ;;  %v1755_v55 = vmul.f32 0.2, %v1751_v54 }
 0xb5e   : > { %v1757_v1 = vsel %vm1753_vm5, %v1751_v54, %v1755_v55 }
 0xb5f   : > { %1764 = vrot.lane.b32.xlu1 %v1757_v1, %s2465_s21  ;;  %1759 = vst [vmem:[%s345_s18 + $0x8] sm:$0xff] %v1757_v1 }
 0xbcd   : > { %v1763_v2 = vpop.permute.xlu0 %1762 }
 0xbce   : > { %1770 = vst.msk [vmem:[#allocation3] sm:$0xff] %vm351_vm1, %v1763_v2 }
 0xbd1   : > { %v1765_v56 = vpop.permute.xlu1 %1764 }
 0xbd2   : > { %v3196_v61 = vsel %vm349_vm0, %v1763_v2, %v1765_v56  ;;  %1772 = vst.msk [vmem:[#allocation3 + $0x10] sm:$0xff] %vm349_vm0, %v1765_v56 }
 0xbd3   : > { %v1797_v62 = vmul.f32 %v3196_v61, %v2593_v22  ;;  %v1794_v9 = vmul.f32 %v3196_v61, %v2599_v24  ;;  %v1791_v22 = vmul.f32 %v3196_v61, %v2618_v33  ;;  %v1788_v24 = vmul.f32 %v3196_v61, %v2623_v35  ;;  %v1776_v35 = vld [vmem:[%s3294_s7 + $0x8] sm:$0xff] }
 0xbd4   : > { %v1785_v33 = vmul.f32 %v3196_v61, %v2642_v44 }
 0xbd5   : > { %v3199_v7 = vld [vmem:[#allocation3] sm:$0xff] }
 0xbd6   : > { %v2415_v0 = vpack.i.bf16 %v3196_v61, %v3199_v7  ;;  %v1796_v12 = vmul.f32 %v3199_v7, %v2566_v10  ;;  %v1793_v4 = vmul.f32 %v3199_v7, %v2570_v13  ;;  %v1790_v10 = vmul.f32 %v3199_v7, %v2587_v20 }
 0xbd7   : > { %v1787_v13 = vmul.f32 %v3199_v7, %v2608_v28  ;;  %v1784_v20 = vmul.f32 %v3199_v7, %v2632_v39  ;;  %v1775_v39 = vld [vmem:[%s3294_s7] sm:$0xff] }
 0xbd8   : > { %2416 = vrot.lane.b32.xlu1 %v2415_v0, %s2470_s25  ;;  %v2425_v8 = vpack.i.bf16 %v1797_v62, %v1796_v12  ;;  %v2435_v11 = vpack.i.bf16 %v1791_v22, %v1790_v10 }
 0xbd9   : > { %v1783_v59 = vld [vmem:[#allocation3 + $0x10] sm:$0xff]  ;;  %v2440_v15 = vpack.i.bf16 %v1788_v24, %v1787_v13  ;;  %v2450_v28 = vpack.i.bf16 %v1785_v33, %v1784_v20 }
 0xbda   : > { %1878 = vrot.lane.b32.xlu2 %v1783_v59, %s2470_s25  ;;  %v1798_v60 = vmul.f32 %v1783_v59, %v2579_v16  ;;  %v1792_v58 = vmul.f32 %v1783_v59, %v2589_v21  ;;  %v1795_v16 = vmul.f32 %v1783_v59, %v2583_v19  ;;  %v2430_v21 = vpack.i.bf16 %v1794_v9, %v1793_v4 }
 0xbdb   : > { %v1789_v19 = vmul.f32 %v1783_v59, %v2614_v31  ;;  %v1786_v31 = vmul.f32 %v1783_v59, %v2636_v41  ;;  %v1779_v9 = vmul.f32 %v3199_v7, %v2545_v3  ;;  %v1774_v3 = vld [vmem:[%s3293_s6 + $0x8] sm:$0xff] }
 0xbdc   : > { %1891 = vrot.lane.b32.xlu0 %v1798_v60, %s2471_s26 }
 0xbe0   : > { %2421 = vrot.lane.b32.xlu1 %v2415_v0, %s2472_s27 }
 0xbe2   : > { %1842 = vrot.lane.b32.xlu2 %v1783_v59, %s2472_s27 }
 0xbe4   : > { %1855 = vrot.lane.b32.xlu0 %v1792_v58, %s2473_s28 }
 0xbe8   : > { %1868 = vrot.lane.b32.xlu1 %v1795_v16, %s2474_s29 }
 0xbea   : > { %2426 = vrot.lane.b32.xlu2 %v2425_v8, %s2471_s26 }
 0xbec   : > { %2431 = vrot.lane.b32.xlu0 %v2430_v21, %s2474_s29  ;;  %v1773_v21 = vld [vmem:[%s3293_s6] sm:$0xff] }
 0xbf0   : > { %1832 = vrot.lane.b32.xlu1 %v1789_v19, %s2475_s11  ;;  %v1780_v19 = vmul.f32 %v3196_v61, %v2555_v6 }
 0xbf2   : > { %2436 = vrot.lane.b32.xlu2 %v2435_v11, %s2473_s28 }
 0xbf4   : > { %2441 = vrot.lane.b32.xlu0 %v2440_v15, %s2475_s11 }
 0xbf8   : > { %2446 = vrot.lane.b32.xlu1 %v2415_v0, %s2476_s12 }
 0xbfa   : > { %2451 = vrot.lane.b32.xlu2 %v2450_v28, %s2477_s13 }
 0xbfc   : > { %1819 = vrot.lane.b32.xlu0 %v1786_v31, %s2477_s13 }
 0xc00   : > { %1904 = vperm.xlu1 %2172, %v1776_v35  }
 0xc02   : > { %1806 = vrot.lane.b32.xlu2 %v1783_v59, %s2476_s12  ;;  %s2106_s12 = sshll.u32 %s3298_s10, 5 }
 0xc03   : > { %s340_s20 = scalar_lea.vmem %s3295_s8, %s2106_s12 }
 0xc04   : > { %1899 = vperm.xlu0 %2254, %v1775_v39  }
 0xc34   : > { %v1879_v44 = vpop.permute.xlu2 %1878 }
 0xc3c   : > { %v1843_v17 = vpop.permute.xlu2 %1842 }
 0xc44   : > { %v2427_v18 = vpop.permute.xlu2 %2426 }
 0xc45   : > { %v2429_v23 = vunpack.i.h.bf16 %v2427_v18  ;;  %v2428_v25 = vunpack.i.l.bf16 %v2427_v18 }
 0xc47   : > { %v1893_v41 = vsel %vm548_vm7, %v2428_v25, %v2429_v23 }
 0xc48   : > { %1920 = vmatpush.msrb.mxu2 %v1893_v41 }
 0xc4a   : > { %v2417_v26 = vpop.permute.xlu1 %2416 }
 0xc4b   : > { %v2419_v27 = vunpack.i.h.bf16 %v2417_v26  ;;  %v2418_v29 = vunpack.i.l.bf16 %v2417_v26 }
 0xc4c   : > { %v2437_v40 = vpop.permute.xlu2 %2436 }
 0xc4d   : > { %v1880_v30 = vsel %vm534_vm8, %v2418_v29, %v2419_v27  ;;  %v1881_v36 = vsel %vm534_vm8, %v2419_v27, %v1879_v44  ;;  %v2439_v45 = vunpack.i.h.bf16 %v2437_v40  ;;  %v2438_v46 = vunpack.i.l.bf16 %v2437_v40 }
 0xc4e   : > { %v1892_v32 = vpop.permute.xlu0 %1891  ;;  %1921 = vmatpush.msrb.mxu2 %v1880_v30 }
 0xc4f   : > { %v1894_v34 = vsel %vm548_vm7, %v2429_v23, %v1892_v32  ;;  %v1857_v63 = vsel %vm509_vm10, %v2438_v46, %v2439_v45 }
 0xc50   : > { %1943 = vmatpush.msrb.mxu3 %v1894_v34 }
 0xc52   : > { %1944 = vmatpush.msrb.mxu3 %v1881_v36  ;;  %v2422_v37 = vpop.permute.xlu1 %2421 }
 0xc53   : > { %v2424_v50 = vunpack.i.h.bf16 %v2422_v37  ;;  %v2423_v48 = vunpack.i.l.bf16 %v2422_v37 }
 0xc54   : > { %v2452_v14 = vpop.permute.xlu2 %2451 }
 0xc55   : > { %v1844_v54 = vsel %vm495_vm11, %v2423_v48, %v2424_v50  ;;  %v1845_v5 = vsel %vm495_vm11, %v2424_v50, %v1843_v17  ;;  %v2454_v1 = vunpack.i.h.bf16 %v2452_v14  ;;  %v2453_v2 = vunpack.i.l.bf16 %v2452_v14 }
 0xc56   : > { %v1856_v38 = vpop.permute.xlu0 %1855 }
 0xc57   : > { %v1858_v53 = vsel %vm509_vm10, %v2439_v45, %v1856_v38  ;;  %v1821_v12 = vsel %vm470_vm13, %v2453_v2, %v2454_v1 }
 0xc5a   : > { %v1869_v42 = vpop.permute.xlu1 %1868 }
 0xc5c   : > { %v1807_v22 = vpop.permute.xlu2 %1806 }
 0xc5e   : > { %v2432_v43 = vpop.permute.xlu0 %2431 }
 0xc5f   : > { %v2434_v49 = vunpack.i.h.bf16 %v2432_v43  ;;  %v2433_v47 = vunpack.i.l.bf16 %v2432_v43 }
 0xc61   : > { %v1870_v51 = vsel %vm523_vm9, %v2433_v47, %v2434_v49  ;;  %v1871_v57 = vsel %vm523_vm9, %v2434_v49, %v1869_v42 }
 0xc62   : > { %1922 = vmatpush.msrb.mxu2 %v1870_v51  ;;  %1945 = vmatpush.msrb.mxu3 %v1871_v57  ;;  %v1833_v52 = vpop.permute.xlu1 %1832 }
 0xc64   : > { %1923 = vmatpush.msrb.mxu2 %v1857_v63  ;;  %1946 = vmatpush.msrb.mxu3 %v1858_v53 }
 0xc66   : > { %v2442_v55 = vpop.permute.xlu0 %2441  ;;  %1924 = vmatpush.msrb.mxu2 %v1844_v54  ;;  %1947 = vmatpush.msrb.mxu3 %v1845_v5 }
 0xc67   : > { %v2444_v56 = vunpack.i.h.bf16 %v2442_v55  ;;  %v2443_v0 = vunpack.i.l.bf16 %v2442_v55 }
 0xc69   : > { %v1834_v59 = vsel %vm484_vm12, %v2443_v0, %v2444_v56  ;;  %v1835_v60 = vsel %vm484_vm12, %v2444_v56, %v1833_v52 }
 0xc6a   : > { %1925 = vmatpush.msrb.mxu2 %v1834_v59  ;;  %1948 = vmatpush.msrb.mxu3 %v1835_v60  ;;  %v2447_v58 = vpop.permute.xlu1 %2446 }
 0xc6b   : > { %v2449_v62 = vunpack.i.h.bf16 %v2447_v58  ;;  %v2448_v4 = vunpack.i.l.bf16 %v2447_v58 }
 0xc6c   : > { %1926 = vmatpush.msrb.mxu2 %v1821_v12 }
 0xc6d   : > { %v1808_v16 = vsel %vm456_vm14, %v2448_v4, %v2449_v62  ;;  %v1809_v13 = vsel %vm456_vm14, %v2449_v62, %v1807_v22 }
 0xc6e   : > { %v1820_v8 = vpop.permute.xlu0 %1819  ;;  %1927 = vmatpush.msrb.mxu2 %v1808_v16 }
 0xc6f   : > { %v1822_v10 = vsel %vm470_vm13, %v2454_v1, %v1820_v8 }
 0xc70   : > { %1949 = vmatpush.msrb.mxu3 %v1822_v10  ;;  %1928 = vmatpush.msrb.mxu2 %v1779_v9 }
 0xc71   : > { %2099 = vmatmul.msk.f32.vlgmr.msrb.gmra.mxu2 %vm558_vm15, %v1773_v21 }
 0xc72   : > { %1950 = vmatpush.msrb.mxu3 %v1809_v13  ;;  %v1905_v28 = vpop.permute.xlu1 %1904 }
 0xc74   : > { %1951 = vmatpush.msrb.mxu3 %v1780_v19 }
 0xc75   : > { %2101 = vmatmul.msk.f32.vlgmr.msrb.gmra.mxu3 %vm558_vm15, %v1773_v21 }
 0xc76   : > { %v1900_v7 = vpop.permute.xlu0 %1899 }
 0xc79   : > { %2100 = vmatmul.msk.f32.gmra.mxu2 %vm558_vm15, %v1774_v3 }
 0xc7d   : > { %2102 = vmatmul.msk.f32.gmra.mxu3 %vm558_vm15, %v1774_v3 }
 0xcf4   : > { %v1930_v11 = vpop.f32.mrf.mxu2 }
 0xcf5   : > { %v1931_v24 = vadd.f32 %v1930_v11, %v1900_v7 }
 0xcf7   : > { %vm1959_vm0 = vcmp.gt.f32.partialorder %v1931_v24, 0.0  ;;  %v1963_v6 = vmul.f32 0.2, %v1931_v24 }
 0xcf8   : > { %v1953_v61 = vpop.f32.mrf.mxu3 }
 0xcf9   : > { %v1967_v15 = vsel %vm1959_vm0, %v1931_v24, %v1963_v6  ;;  %v1954_v20 = vadd.f32 %v1953_v61, %v1900_v7 }
 0xcfa   : > { %1971 = vst [vmem:[%s340_s20] sm:$0xff] %v1967_v15 }
 0xcfb   : > { %vm1960_vm1 = vcmp.gt.f32.partialorder %v1954_v20, 0.0  ;;  %v1964_v33 = vmul.f32 0.2, %v1954_v20 }
 0xcfc   : > { %v1933_v31 = vpop.f32.mrf.mxu2 }
 0xcfd   : > { %v1968_v35 = vsel %vm1960_vm1, %v1954_v20, %v1964_v33  ;;  %v1934_v39 = vadd.f32 %v1933_v31, %v1905_v28 }
 0xcfe   : > { %1972 = vst [vmem:[%s340_s20 + $0x8] sm:$0xff] %v1968_v35 }
 0xcff   : > { %vm1961_vm7 = vcmp.gt.f32.partialorder %v1934_v39, 0.0  ;;  %v1965_v44 = vmul.f32 0.2, %v1934_v39 }
 0xd00   : > { %v1956_v17 = vpop.f32.mrf.mxu3 }
 0xd01   : > { %v1969_v18 = vsel %vm1961_vm7, %v1934_v39, %v1965_v44  ;;  %v1957_v23 = vadd.f32 %v1956_v17, %v1905_v28 }
 0xd02   : > { %1973 = vst [vmem:[%s340_s20 + $0x10] sm:$0xff] %v1969_v18 }
 0xd03   : > { %vm1962_vm8 = vcmp.gt.f32.partialorder %v1957_v23, 0.0  ;;  %v1966_v25 = vmul.f32 0.2, %v1957_v23 }
 0xd05   : > { %v1970_v41 = vsel %vm1962_vm8, %v1957_v23, %v1966_v25 }
 0xd06   : > { %1974 = vst [vmem:[%s340_s20 + $0x18] sm:$0xff] %v1970_v41 }
 0xd07 PF: > { %s20_s30 = sadd.s32 1, %s2461_s30  }
 0xd08   : > { %p17_p4 = scmp.ge.s32.totalorder %s20_s30, 4  }
 0xd0a   :  { %19 = sbr.rel (!%p17_p4) target bundleno = 1 (0x1), region = 105 }

</bundles_post_ra>
